<compile_context>
chip_gen: v6e
topology: v6e:2x2x1
jax: 0.10.0
libtpu: 0.0.40
codegen_flags: <defaults>
</compile_context>

<pallas_src>
import functools

import jax
import jax.numpy as jnp
from jax import lax
from jax.experimental import pallas as pl
from jax.experimental.pallas import tpu as pltpu


def _round_up(v, m):
    return ((v + m - 1) // m) * m


# ----------------------------------------------------------------------------
# Fused Pallas kernel: one grid step == one LSTM layer (5 stacks x num_layers)
# ----------------------------------------------------------------------------
def _deep_lstm_kernel(x_ref, wih_ref, whh_ref, b_ref,
                      hn_ref, cn_ref,
                      act_scr, proj_scr,
                      *, T, B_pad, NL):
    """Fused multi-stack, multi-layer LSTM recurrence (grid axis = layer).

    x_ref:    (T*B_pad, D_pad)  bf16  time-major, batch/feature-padded input
    wih_ref:  (1, D_pad, 4H)    bf16  this layer's input->gate weights (W^T)
    whh_ref:  (1, H,    4H)     bf16  this layer's hidden->gate weights (W^T)
    b_ref:    (1, 1,    4H)     f32   this layer's combined bias (b_ih + b_hh)
    hn_ref:   (NTL, B_pad, H)   f32   final hidden states (resident output)
    cn_ref:   (NTL, B_pad, H)   f32   final cell states   (resident output)
    act_scr:  (T*B_pad, H)      bf16  inter-layer activation sequence (VMEM)
    proj_scr: (T*B_pad, 4H)     bf16  hoisted input projection of this layer
    """
    H = whh_ref.shape[1]
    g = pl.program_id(0)
    unroll = T if T <= 8 else 8

    # --- 1. Hoisted input projection over the full sequence (one matmul,
    #        off the serial path).  Bias excluded; re-added in f32 per step.
    @pl.when(g == 0)
    def _():
        proj_scr[...] = jnp.dot(
            x_ref[...], wih_ref[0],
            preferred_element_type=jnp.float32).astype(jnp.bfloat16)

    @pl.when(g > 0)
    def _():
        w_in = wih_ref[0]                                   # (D_pad, 4H) bf16
        proj_scr[...] = jnp.dot(
            act_scr[...], w_in[:H, :],
            preferred_element_type=jnp.float32).astype(jnp.bfloat16)

    # --- 2. Initial states: stacks 0..2 zeros; stacks 3/4 seeded with the
    #        final state of the same layer index in the previous stack
    #        (read back from the resident hn/cn output blocks).
    seed = g >= 3 * NL
    src = jnp.maximum(g - NL, 0)
    h0 = jnp.where(seed, hn_ref[src], 0.0)
    c0 = jnp.where(seed, cn_ref[src], 0.0)

    # --- 3. Time recurrence: only h @ W_hh + gate math on the serial chain;
    #        h/c live in vregs as fori_loop carries.
    w_hh = whh_ref[0]                                       # (H, 4H) bf16
    bias_b = jnp.broadcast_to(b_ref[0], (B_pad, 4 * H))     # f32, hoisted

    def step(t, carry):
        h, c = carry
        row = pl.multiple_of(t * B_pad, B_pad)              # tile-aligned
        gates = (jnp.dot(h.astype(jnp.bfloat16), w_hh,
                         preferred_element_type=jnp.float32)
                 + proj_scr[pl.ds(row, B_pad), :] + bias_b)  # (B_pad, 4H) f32
        # Params are pre-scaled so i/f/o lanes hold z/2 and g lanes hold z:
        # sigmoid(z) == 0.5*tanh(z/2) + 0.5  -> one tanh pass over the tile.
        tg = jnp.tanh(gates)
        i_g = 0.5 * tg[:, 0:H] + 0.5
        f_g = 0.5 * tg[:, H:2 * H] + 0.5
        g_g = tg[:, 2 * H:3 * H]
        o_g = 0.5 * tg[:, 3 * H:4 * H] + 0.5
        c_new = f_g * c + i_g * g_g
        h_new = o_g * jnp.tanh(c_new)
        act_scr[pl.ds(row, B_pad), :] = h_new.astype(jnp.bfloat16)
        return (h_new, c_new)

    h_fin, c_fin = lax.fori_loop(0, T, step, (h0, c0), unroll=unroll)

    # --- 4. Final states of this layer (resident output, dynamic row write).
    hn_ref[g] = h_fin
    cn_ref[g] = c_fin


# ----------------------------------------------------------------------------
# Parameter construction: PyTorch-style init, packed ONCE into kernel layout
# ----------------------------------------------------------------------------
def init_deep_lstm_params(key, input_dim, hidden, num_layers):
    """Uniform(-1/sqrt(H), 1/sqrt(H)) params packed into kernel layout:
    pre-transposed weights, pre-combined bias, bf16 matmul operands, and the
    0.5 gate scale (for the tanh-form sigmoid) folded into the i/f/o columns
    (exact in bf16 / f32, so forward semantics are unchanged)."""
    H = hidden
    NL = num_layers
    D_pad = max(_round_up(input_dim, 8), H)
    bound = 1.0 / (H ** 0.5)
    stack_in = [input_dim, H, H, H, H]          # lstm1..lstm5 layer-0 inputs

    gate_scale = jnp.concatenate([
        jnp.full((H,), 0.5, jnp.float32),       # i
        jnp.full((H,), 0.5, jnp.float32),       # f
        jnp.ones((H,), jnp.float32),            # g (tanh gate, unscaled)
        jnp.full((H,), 0.5, jnp.float32)])      # o

    wih, whh, bias = [], [], []
    for s in range(5):
        for l in range(NL):
            d_in = stack_in[s] if l == 0 else H
            key, k1, k2, k3, k4 = jax.random.split(key, 5)
            w_ih = jax.random.uniform(k1, (4 * H, d_in), jnp.float32, -bound, bound)
            w_hh = jax.random.uniform(k2, (4 * H, H), jnp.float32, -bound, bound)
            b_ih = jax.random.uniform(k3, (4 * H,), jnp.float32, -bound, bound)
            b_hh = jax.random.uniform(k4, (4 * H,), jnp.float32, -bound, bound)
            wih_t = jnp.zeros((D_pad, 4 * H), jnp.float32).at[:d_in, :].set(w_ih.T)
            wih.append(wih_t * gate_scale[None, :])
            whh.append(w_hh.T * gate_scale[None, :])
            bias.append(((b_ih + b_hh) * gate_scale).reshape(1, 4 * H))

    key, k1, k2 = jax.random.split(key, 3)
    return {
        "wih": jnp.stack(wih).astype(jnp.bfloat16),      # (NTL, D_pad, 4H)
        "whh": jnp.stack(whh).astype(jnp.bfloat16),      # (NTL, H, 4H)
        "b": jnp.stack(bias),                            # (NTL, 1, 4H) f32
        "dec_w_t": jax.random.uniform(k1, (H, 1), jnp.float32, -bound, bound),
        "dec_b": jax.random.uniform(k2, (1,), jnp.float32, -bound, bound),
    }


# ----------------------------------------------------------------------------
# Full DeepLSTM forward (single pallas_call + tiny decoder in XLA)
# ----------------------------------------------------------------------------
@functools.partial(jax.jit, static_argnames=("num_layers", "hidden"))
def deep_lstm_forward(params, x, *, num_layers, hidden):
    B, T, D_in = x.shape
    H, NL = hidden, num_layers
    NTL = params["wih"].shape[0]
    D_pad = params["wih"].shape[1]
    # Pad batch to the bf16 sublane pack (16): per-step bf16 scratch slices
    # stay native-tile aligned on the serial path.
    B_pad = _round_up(max(B, 1), 16)

    # (B, T, D) -> time-major, zero-pad batch/feature, flatten to 2D bf16.
    x_t = jnp.transpose(x, (1, 0, 2))
    x_t = jnp.pad(x_t, ((0, 0), (0, B_pad - B), (0, D_pad - D_in)))
    x2d = x_t.reshape(T * B_pad, D_pad).astype(jnp.bfloat16)

    kernel = functools.partial(_deep_lstm_kernel, T=T, B_pad=B_pad, NL=NL)

    # Explicit VMEM budget (default scoped limit is only 16/32 MiB).
    w_blk = (D_pad * 4 * H + H * 4 * H) * 2 + 4 * H * 4
    vmem_est = (T * B_pad * D_pad * 2            # resident input x (bf16)
                + 2 * w_blk                      # double-buffered layer weights
                + 2 * NTL * B_pad * H * 4        # resident hn/cn outputs (f32)
                + T * B_pad * H * 2              # act scratch (bf16)
                + T * B_pad * 4 * H * 2)         # proj scratch (bf16)
    vmem_limit = int(min(100 * 1024 * 1024, max(4 * 1024 * 1024, 2 * vmem_est)))

    grid_spec = pltpu.PrefetchScalarGridSpec(
        num_scalar_prefetch=0,
        grid=(NTL,),
        in_specs=[
            pl.BlockSpec((T * B_pad, D_pad), lambda g: (0, 0)),      # x (resident)
            pl.BlockSpec((1, D_pad, 4 * H), lambda g: (g, 0, 0)),    # W_ih^T
            pl.BlockSpec((1, H, 4 * H), lambda g: (g, 0, 0)),        # W_hh^T
            pl.BlockSpec((1, 1, 4 * H), lambda g: (g, 0, 0)),        # bias
        ],
        out_specs=(
            pl.BlockSpec((NTL, B_pad, H), lambda g: (0, 0, 0)),      # hn
            pl.BlockSpec((NTL, B_pad, H), lambda g: (0, 0, 0)),      # cn
        ),
        scratch_shapes=[
            pltpu.VMEM((T * B_pad, H), jnp.bfloat16),        # inter-layer acts
            pltpu.VMEM((T * B_pad, 4 * H), jnp.bfloat16),    # hoisted projection
        ],
    )

    hn_all, cn_all = pl.pallas_call(
        kernel,
        out_shape=(jax.ShapeDtypeStruct((NTL, B_pad, H), jnp.float32),
                   jax.ShapeDtypeStruct((NTL, B_pad, H), jnp.float32)),
        grid_spec=grid_spec,
        compiler_params=pltpu.CompilerParams(
            dimension_semantics=("arbitrary",),
            vmem_limit_bytes=vmem_limit),
    )(x2d, params["wih"], params["whh"], params["b"])

    hn5 = hn_all[NTL - NL:, :B, :]               # final states of lstm5 layers
    cn5 = cn_all[NTL - NL:, :B, :]
    x6_last = hn_all[NTL - 1, :B, :]             # == x6[:, -1, :]
    output = jnp.dot(x6_last, params["dec_w_t"]) + params["dec_b"]   # (B, 1)
    # final_dropout / lstm_dropout elided (eval mode)
    return output, (hn5, cn5)


# ----------------------------------------------------------------------------
# Pure-JAX reference (same packed params / gate formula) for a parity check
# ----------------------------------------------------------------------------
def _reference_forward(params, x, *, num_layers, hidden):
    B, T, _ = x.shape
    H, NL = hidden, num_layers
    wih = params["wih"].astype(jnp.float32)
    whh = params["whh"].astype(jnp.float32)
    b = params["b"][:, 0, :]
    NTL = wih.shape[0]

    seq = x
    hn = [None] * NTL
    cn = [None] * NTL
    for g in range(NTL):
        stack, layer = g // NL, g % NL
        d_in = seq.shape[-1]
        w_in, w_hh, bias = wih[g, :d_in, :], whh[g], b[g]
        if stack <= 2:
            h = jnp.zeros((B, H), jnp.float32)
            c = jnp.zeros((B, H), jnp.float32)
        else:
            src = (stack - 1) * NL + layer
            h, c = hn[src], cn[src]
        outs = []
        for t in range(T):
            z = seq[:, t, :] @ w_in + h @ w_hh + bias
            i_g = 0.5 * jnp.tanh(z[:, 0:H]) + 0.5
            f_g = 0.5 * jnp.tanh(z[:, H:2 * H]) + 0.5
            g_g = jnp.tanh(z[:, 2 * H:3 * H])
            o_g = 0.5 * jnp.tanh(z[:, 3 * H:4 * H]) + 0.5
            c = f_g * c + i_g * g_g
            h = o_g * jnp.tanh(c)
            outs.append(h)
        seq = jnp.stack(outs, axis=1)
        hn[g], cn[g] = h, c
    out = seq[:, -1, :] @ params["dec_w_t"] + params["dec_b"]
    return out, (jnp.stack(hn[NTL - NL:], 0), jnp.stack(cn[NTL - NL:], 0))


if __name__ == "__main__":
    # Small shapes: batch=2, seq=8, input_dim=16, hd1=hd2=hd3=32, num_layers=2
    B, T, D_IN, H, NL = 2, 8, 16, 32, 2

    key = jax.random.PRNGKey(0)
    key, pkey, xkey = jax.random.split(key, 3)
    params = init_deep_lstm_params(pkey, D_IN, H, NL)
    x = jax.random.normal(xkey, (B, T, D_IN), jnp.float32)

    out, (hn, cn) = deep_lstm_forward(params, x, num_layers=NL, hidden=H)
    out = jax.block_until_ready(out)
    hn = jax.block_until_ready(hn)
    cn = jax.block_until_ready(cn)

    assert out.shape == (B, 1)
    assert hn.shape == (NL, B, H) and cn.shape == (NL, B, H)
    assert jnp.all(jnp.isfinite(out)) and jnp.all(jnp.isfinite(hn)) and jnp.all(jnp.isfinite(cn))

    # Loose parity check vs. pure-JAX f32 reference (bf16 MXU operands in kernel).
    ref_out, (ref_hn, ref_cn) = _reference_forward(params, x, num_layers=NL, hidden=H)
    assert float(jnp.max(jnp.abs(out - ref_out))) < 1e-1
    assert float(jnp.max(jnp.abs(hn - ref_hn))) < 1e-1
    assert float(jnp.max(jnp.abs(cn - ref_cn))) < 1e-1

    print("KERNEL_OK")
</pallas_src>

<mosaic_0001>
module attributes {stable_mosaic.version = 11 : i64} {
  func.func @_deep_lstm_kernel(%arg0: i32, %arg1: memref<128x32xbf16, #tpu.memory_space<vmem>>, %arg2: memref<1x32x128xbf16, #tpu.memory_space<vmem>>, %arg3: memref<1x32x128xbf16, #tpu.memory_space<vmem>>, %arg4: memref<1x1x128xf32, #tpu.memory_space<vmem>>, %arg5: memref<10x16x32xf32, #tpu.memory_space<vmem>>, %arg6: memref<10x16x32xf32, #tpu.memory_space<vmem>>, %arg7: memref<128x32xbf16, #tpu.memory_space<vmem>>, %arg8: memref<128x128xbf16, #tpu.memory_space<vmem>>) attributes {dimension_semantics = [#tpu.dimension_semantics<arbitrary>], iteration_bounds = array<i64: 10>, scalar_prefetch = 0 : i64, scratch_operands = 2 : i64, tpu.core_type = #tpu.core_type<tc>, window_params = [{pipeline_mode = #tpu.pipeline_mode<synchronous>, transform_indices = @transform_0, window_bounds = array<i64: 128, 32>}, {transform_indices = @transform_1, window_bounds = array<i64: 1, 32, 128>}, {transform_indices = @transform_2, window_bounds = array<i64: 1, 32, 128>}, {transform_indices = @transform_3, window_bounds = array<i64: 1, 1, 128>}, {pipeline_mode = #tpu.pipeline_mode<synchronous>, transform_indices = @transform_4, window_bounds = array<i64: 10, 16, 32>}, {pipeline_mode = #tpu.pipeline_mode<synchronous>, transform_indices = @transform_5, window_bounds = array<i64: 10, 16, 32>}]} {
    %c0_i32 = arith.constant 0 : i32
    %0 = arith.cmpi eq, %arg0, %c0_i32 : i32
    %1 = arith.extui %0 : i1 to i32
    %c0_i32_0 = arith.constant 0 : i32
    %2 = arith.cmpi ne, %1, %c0_i32_0 : i32
    scf.if %2 {
      %c0_100 = arith.constant 0 : index
      %c0_101 = arith.constant 0 : index
      %305 = vector.load %arg1[%c0_100, %c0_101] : memref<128x32xbf16, #tpu.memory_space<vmem>>, vector<128x32xbf16>
      %c0_102 = arith.constant 0 : index
      %c0_103 = arith.constant 0 : index
      %c0_104 = arith.constant 0 : index
      %306 = vector.load %arg2[%c0_102, %c0_103, %c0_104] : memref<1x32x128xbf16, #tpu.memory_space<vmem>>, vector<1x32x128xbf16>
      %307 = vector.shape_cast %306 : vector<1x32x128xbf16> to vector<32x128xbf16>
      %cst_105 = arith.constant dense<0.000000e+00> : vector<128x128xf32>
      %308 = tpu.matmul %305, %307, %cst_105 {dimension_numbers = #tpu.dot_dimension_numbers<[1], [0], [0], [1], [0, 0, 1, 1], [], []>} : vector<128x32xbf16>, vector<32x128xbf16>, vector<128x128xf32> -> vector<128x128xf32>
      %309 = arith.truncf %308 : vector<128x128xf32> to vector<128x128xbf16>
      %c0_106 = arith.constant 0 : index
      %c0_107 = arith.constant 0 : index
      %310 = vector.load %arg8[%c0_106, %c0_107] : memref<128x128xbf16, #tpu.memory_space<vmem>>, vector<128x128xbf16>
      tpu.vector_store %arg8[%c0_106, %c0_107], %309 {strides = array<i32>} : memref<128x128xbf16, #tpu.memory_space<vmem>>, vector<128x128xbf16>,
    } else {
    }
    %c0_i32_1 = arith.constant 0 : i32
    %3 = arith.cmpi sgt, %arg0, %c0_i32_1 : i32
    %4 = arith.extui %3 : i1 to i32
    %c0_i32_2 = arith.constant 0 : i32
    %5 = arith.cmpi ne, %4, %c0_i32_2 : i32
    scf.if %5 {
      %c0_100 = arith.constant 0 : index
      %c0_101 = arith.constant 0 : index
      %c0_102 = arith.constant 0 : index
      %305 = vector.load %arg2[%c0_100, %c0_101, %c0_102] : memref<1x32x128xbf16, #tpu.memory_space<vmem>>, vector<1x32x128xbf16>
      %306 = vector.shape_cast %305 : vector<1x32x128xbf16> to vector<32x128xbf16>
      %c0_103 = arith.constant 0 : index
      %c0_104 = arith.constant 0 : index
      %307 = vector.load %arg7[%c0_103, %c0_104] : memref<128x32xbf16, #tpu.memory_space<vmem>>, vector<128x32xbf16>
      %cst_105 = arith.constant dense<0.000000e+00> : vector<128x128xf32>
      %308 = tpu.matmul %307, %306, %cst_105 {dimension_numbers = #tpu.dot_dimension_numbers<[1], [0], [0], [1], [0, 0, 1, 1], [], []>} : vector<128x32xbf16>, vector<32x128xbf16>, vector<128x128xf32> -> vector<128x128xf32>
      %309 = arith.truncf %308 : vector<128x128xf32> to vector<128x128xbf16>
      %c0_106 = arith.constant 0 : index
      %c0_107 = arith.constant 0 : index
      %310 = vector.load %arg8[%c0_106, %c0_107] : memref<128x128xbf16, #tpu.memory_space<vmem>>, vector<128x128xbf16>
      tpu.vector_store %arg8[%c0_106, %c0_107], %309 {strides = array<i32>} : memref<128x128xbf16, #tpu.memory_space<vmem>>, vector<128x128xbf16>,
    } else {
    }
    %c6_i32 = arith.constant 6 : i32
    %6 = arith.cmpi sge, %arg0, %c6_i32 : i32
    %c2_i32 = arith.constant 2 : i32
    %7 = arith.subi %arg0, %c2_i32 : i32
    %c0_i32_3 = arith.constant 0 : i32
    %8 = arith.maxsi %7, %c0_i32_3 : i32
    %9 = arith.index_cast %8 : i32 to index
    %c0 = arith.constant 0 : index
    %c0_4 = arith.constant 0 : index
    %10 = vector.load %arg5[%9, %c0, %c0_4] : memref<10x16x32xf32, #tpu.memory_space<vmem>>, vector<1x16x32xf32>
    %11 = vector.shape_cast %10 : vector<1x16x32xf32> to vector<16x32xf32>
    %cst = arith.constant 0.000000e+00 : f32
    %12 = vector.broadcast %cst : f32 to vector<16x32xf32>
    %13 = arith.select %6, %11, %12 : vector<16x32xf32>
    %14 = arith.index_cast %8 : i32 to index
    %c0_5 = arith.constant 0 : index
    %c0_6 = arith.constant 0 : index
    %15 = vector.load %arg6[%14, %c0_5, %c0_6] : memref<10x16x32xf32, #tpu.memory_space<vmem>>, vector<1x16x32xf32>
    %16 = vector.shape_cast %15 : vector<1x16x32xf32> to vector<16x32xf32>
    %cst_7 = arith.constant 0.000000e+00 : f32
    %17 = vector.broadcast %cst_7 : f32 to vector<16x32xf32>
    %18 = arith.select %6, %16, %17 : vector<16x32xf32>
    %c0_8 = arith.constant 0 : index
    %c0_9 = arith.constant 0 : index
    %c0_10 = arith.constant 0 : index
    %19 = vector.load %arg3[%c0_8, %c0_9, %c0_10] : memref<1x32x128xbf16, #tpu.memory_space<vmem>>, vector<1x32x128xbf16>
    %20 = vector.shape_cast %19 : vector<1x32x128xbf16> to vector<32x128xbf16>
    %c0_11 = arith.constant 0 : index
    %c0_12 = arith.constant 0 : index
    %c0_13 = arith.constant 0 : index
    %21 = vector.load %arg4[%c0_11, %c0_12, %c0_13] : memref<1x1x128xf32, #tpu.memory_space<vmem>>, vector<1x1x128xf32>
    %22 = vector.shape_cast %21 : vector<1x1x128xf32> to vector<1x128xf32>
    %23 = vector.shape_cast %22 : vector<1x128xf32> to vector<1x128xf32>
    %24 = vector.broadcast %23 : vector<1x128xf32> to vector<16x128xf32>
    %c0_i32_14 = arith.constant 0 : i32
    %c16_i32 = arith.constant 16 : i32
    %25 = arith.muli %c0_i32_14, %c16_i32 : i32
    %26 = tpu.assume_multiple %25, 16 : i32
    %27 = arith.truncf %13 : vector<16x32xf32> to vector<16x32xbf16>
    %cst_15 = arith.constant dense<0.000000e+00> : vector<16x128xf32>
    %28 = tpu.matmul %27, %20, %cst_15 {dimension_numbers = #tpu.dot_dimension_numbers<[1], [0], [0], [1], [0, 0, 1, 1], [], []>} : vector<16x32xbf16>, vector<32x128xbf16>, vector<16x128xf32> -> vector<16x128xf32>
    %29 = arith.index_cast %26 : i32 to index
    %c0_16 = arith.constant 0 : index
    %30 = vector.load %arg8[%29, %c0_16] : memref<128x128xbf16, #tpu.memory_space<vmem>>, vector<16x128xbf16>
    %31 = arith.extf %30 : vector<16x128xbf16> to vector<16x128xf32>
    %32 = arith.addf %28, %31 : vector<16x128xf32>
    %33 = arith.addf %32, %24 : vector<16x128xf32>
    %34 = math.tanh %33 : vector<16x128xf32>
    %35 = vector.extract_strided_slice %34 {offsets = [0, 0], sizes = [16, 32], strides = [1, 1]} : vector<16x128xf32> to vector<16x32xf32>
    %cst_17 = arith.constant 5.000000e-01 : f32
    %36 = vector.broadcast %cst_17 : f32 to vector<16x32xf32>
    %37 = arith.mulf %36, %35 : vector<16x32xf32>
    %cst_18 = arith.constant 5.000000e-01 : f32
    %38 = vector.broadcast %cst_18 : f32 to vector<16x32xf32>
    %39 = arith.addf %37, %38 : vector<16x32xf32>
    %40 = vector.extract_strided_slice %34 {offsets = [0, 32], sizes = [16, 32], strides = [1, 1]} : vector<16x128xf32> to vector<16x32xf32>
    %cst_19 = arith.constant 5.000000e-01 : f32
    %41 = vector.broadcast %cst_19 : f32 to vector<16x32xf32>
    %42 = arith.mulf %41, %40 : vector<16x32xf32>
    %cst_20 = arith.constant 5.000000e-01 : f32
    %43 = vector.broadcast %cst_20 : f32 to vector<16x32xf32>
    %44 = arith.addf %42, %43 : vector<16x32xf32>
    %45 = vector.extract_strided_slice %34 {offsets = [0, 64], sizes = [16, 32], strides = [1, 1]} : vector<16x128xf32> to vector<16x32xf32>
    %46 = vector.extract_strided_slice %34 {offsets = [0, 96], sizes = [16, 32], strides = [1, 1]} : vector<16x128xf32> to vector<16x32xf32>
    %cst_21 = arith.constant 5.000000e-01 : f32
    %47 = vector.broadcast %cst_21 : f32 to vector<16x32xf32>
    %48 = arith.mulf %47, %46 : vector<16x32xf32>
    %cst_22 = arith.constant 5.000000e-01 : f32
    %49 = vector.broadcast %cst_22 : f32 to vector<16x32xf32>
    %50 = arith.addf %48, %49 : vector<16x32xf32>
    %51 = arith.mulf %44, %18 : vector<16x32xf32>
    %52 = arith.mulf %39, %45 : vector<16x32xf32>
    %53 = arith.addf %51, %52 : vector<16x32xf32>
    %54 = math.tanh %53 : vector<16x32xf32>
    %55 = arith.mulf %50, %54 : vector<16x32xf32>
    %56 = arith.truncf %55 : vector<16x32xf32> to vector<16x32xbf16>
    %57 = arith.index_cast %26 : i32 to index
    %c0_23 = arith.constant 0 : index
    %58 = vector.load %arg7[%57, %c0_23] : memref<128x32xbf16, #tpu.memory_space<vmem>>, vector<16x32xbf16>
    tpu.vector_store %arg7[%57, %c0_23], %56 {strides = array<i32>} : memref<128x32xbf16, #tpu.memory_space<vmem>>, vector<16x32xbf16>,
    %c1_i32 = arith.constant 1 : i32
    %c16_i32_24 = arith.constant 16 : i32
    %59 = arith.muli %c1_i32, %c16_i32_24 : i32
    %60 = tpu.assume_multiple %59, 16 : i32
    %61 = arith.truncf %55 : vector<16x32xf32> to vector<16x32xbf16>
    %cst_25 = arith.constant dense<0.000000e+00> : vector<16x128xf32>
    %62 = tpu.matmul %61, %20, %cst_25 {dimension_numbers = #tpu.dot_dimension_numbers<[1], [0], [0], [1], [0, 0, 1, 1], [], []>} : vector<16x32xbf16>, vector<32x128xbf16>, vector<16x128xf32> -> vector<16x128xf32>
    %63 = arith.index_cast %60 : i32 to index
    %c0_26 = arith.constant 0 : index
    %64 = vector.load %arg8[%63, %c0_26] : memref<128x128xbf16, #tpu.memory_space<vmem>>, vector<16x128xbf16>
    %65 = arith.extf %64 : vector<16x128xbf16> to vector<16x128xf32>
    %66 = arith.addf %62, %65 : vector<16x128xf32>
    %67 = arith.addf %66, %24 : vector<16x128xf32>
    %68 = math.tanh %67 : vector<16x128xf32>
    %69 = vector.extract_strided_slice %68 {offsets = [0, 0], sizes = [16, 32], strides = [1, 1]} : vector<16x128xf32> to vector<16x32xf32>
    %cst_27 = arith.constant 5.000000e-01 : f32
    %70 = vector.broadcast %cst_27 : f32 to vector<16x32xf32>
    %71 = arith.mulf %70, %69 : vector<16x32xf32>
    %cst_28 = arith.constant 5.000000e-01 : f32
    %72 = vector.broadcast %cst_28 : f32 to vector<16x32xf32>
    %73 = arith.addf %71, %72 : vector<16x32xf32>
    %74 = vector.extract_strided_slice %68 {offsets = [0, 32], sizes = [16, 32], strides = [1, 1]} : vector<16x128xf32> to vector<16x32xf32>
    %cst_29 = arith.constant 5.000000e-01 : f32
    %75 = vector.broadcast %cst_29 : f32 to vector<16x32xf32>
    %76 = arith.mulf %75, %74 : vector<16x32xf32>
    %cst_30 = arith.constant 5.000000e-01 : f32
    %77 = vector.broadcast %cst_30 : f32 to vector<16x32xf32>
    %78 = arith.addf %76, %77 : vector<16x32xf32>
    %79 = vector.extract_strided_slice %68 {offsets = [0, 64], sizes = [16, 32], strides = [1, 1]} : vector<16x128xf32> to vector<16x32xf32>
    %80 = vector.extract_strided_slice %68 {offsets = [0, 96], sizes = [16, 32], strides = [1, 1]} : vector<16x128xf32> to vector<16x32xf32>
    %cst_31 = arith.constant 5.000000e-01 : f32
    %81 = vector.broadcast %cst_31 : f32 to vector<16x32xf32>
    %82 = arith.mulf %81, %80 : vector<16x32xf32>
    %cst_32 = arith.constant 5.000000e-01 : f32
    %83 = vector.broadcast %cst_32 : f32 to vector<16x32xf32>
    %84 = arith.addf %82, %83 : vector<16x32xf32>
    %85 = arith.mulf %78, %53 : vector<16x32xf32>
    %86 = arith.mulf %73, %79 : vector<16x32xf32>
    %87 = arith.addf %85, %86 : vector<16x32xf32>
    %88 = math.tanh %87 : vector<16x32xf32>
    %89 = arith.mulf %84, %88 : vector<16x32xf32>
    %90 = arith.truncf %89 : vector<16x32xf32> to vector<16x32xbf16>
    %91 = arith.index_cast %60 : i32 to index
    %c0_33 = arith.constant 0 : index
    %92 = vector.load %arg7[%91, %c0_33] : memref<128x32xbf16, #tpu.memory_space<vmem>>, vector<16x32xbf16>
    tpu.vector_store %arg7[%91, %c0_33], %90 {strides = array<i32>} : memref<128x32xbf16, #tpu.memory_space<vmem>>, vector<16x32xbf16>,
    %c2_i32_34 = arith.constant 2 : i32
    %c16_i32_35 = arith.constant 16 : i32
    %93 = arith.muli %c2_i32_34, %c16_i32_35 : i32
    %94 = tpu.assume_multiple %93, 16 : i32
    %95 = arith.truncf %89 : vector<16x32xf32> to vector<16x32xbf16>
    %cst_36 = arith.constant dense<0.000000e+00> : vector<16x128xf32>
    %96 = tpu.matmul %95, %20, %cst_36 {dimension_numbers = #tpu.dot_dimension_numbers<[1], [0], [0], [1], [0, 0, 1, 1], [], []>} : vector<16x32xbf16>, vector<32x128xbf16>, vector<16x128xf32> -> vector<16x128xf32>
    %97 = arith.index_cast %94 : i32 to index
    %c0_37 = arith.constant 0 : index
    %98 = vector.load %arg8[%97, %c0_37] : memref<128x128xbf16, #tpu.memory_space<vmem>>, vector<16x128xbf16>
    %99 = arith.extf %98 : vector<16x128xbf16> to vector<16x128xf32>
    %100 = arith.addf %96, %99 : vector<16x128xf32>
    %101 = arith.addf %100, %24 : vector<16x128xf32>
    %102 = math.tanh %101 : vector<16x128xf32>
    %103 = vector.extract_strided_slice %102 {offsets = [0, 0], sizes = [16, 32], strides = [1, 1]} : vector<16x128xf32> to vector<16x32xf32>
    %cst_38 = arith.constant 5.000000e-01 : f32
    %104 = vector.broadcast %cst_38 : f32 to vector<16x32xf32>
    %105 = arith.mulf %104, %103 : vector<16x32xf32>
    %cst_39 = arith.constant 5.000000e-01 : f32
    %106 = vector.broadcast %cst_39 : f32 to vector<16x32xf32>
    %107 = arith.addf %105, %106 : vector<16x32xf32>
    %108 = vector.extract_strided_slice %102 {offsets = [0, 32], sizes = [16, 32], strides = [1, 1]} : vector<16x128xf32> to vector<16x32xf32>
    %cst_40 = arith.constant 5.000000e-01 : f32
    %109 = vector.broadcast %cst_40 : f32 to vector<16x32xf32>
    %110 = arith.mulf %109, %108 : vector<16x32xf32>
    %cst_41 = arith.constant 5.000000e-01 : f32
    %111 = vector.broadcast %cst_41 : f32 to vector<16x32xf32>
    %112 = arith.addf %110, %111 : vector<16x32xf32>
    %113 = vector.extract_strided_slice %102 {offsets = [0, 64], sizes = [16, 32], strides = [1, 1]} : vector<16x128xf32> to vector<16x32xf32>
    %114 = vector.extract_strided_slice %102 {offsets = [0, 96], sizes = [16, 32], strides = [1, 1]} : vector<16x128xf32> to vector<16x32xf32>
    %cst_42 = arith.constant 5.000000e-01 : f32
    %115 = vector.broadcast %cst_42 : f32 to vector<16x32xf32>
    %116 = arith.mulf %115, %114 : vector<16x32xf32>
    %cst_43 = arith.constant 5.000000e-01 : f32
    %117 = vector.broadcast %cst_43 : f32 to vector<16x32xf32>
    %118 = arith.addf %116, %117 : vector<16x32xf32>
    %119 = arith.mulf %112, %87 : vector<16x32xf32>
    %120 = arith.mulf %107, %113 : vector<16x32xf32>
    %121 = arith.addf %119, %120 : vector<16x32xf32>
    %122 = math.tanh %121 : vector<16x32xf32>
    %123 = arith.mulf %118, %122 : vector<16x32xf32>
    %124 = arith.truncf %123 : vector<16x32xf32> to vector<16x32xbf16>
    %125 = arith.index_cast %94 : i32 to index
    %c0_44 = arith.constant 0 : index
    %126 = vector.load %arg7[%125, %c0_44] : memref<128x32xbf16, #tpu.memory_space<vmem>>, vector<16x32xbf16>
    tpu.vector_store %arg7[%125, %c0_44], %124 {strides = array<i32>} : memref<128x32xbf16, #tpu.memory_space<vmem>>, vector<16x32xbf16>,
    %c3_i32 = arith.constant 3 : i32
    %c16_i32_45 = arith.constant 16 : i32
    %127 = arith.muli %c3_i32, %c16_i32_45 : i32
    %128 = tpu.assume_multiple %127, 16 : i32
    %129 = arith.truncf %123 : vector<16x32xf32> to vector<16x32xbf16>
    %cst_46 = arith.constant dense<0.000000e+00> : vector<16x128xf32>
    %130 = tpu.matmul %129, %20, %cst_46 {dimension_numbers = #tpu.dot_dimension_numbers<[1], [0], [0], [1], [0, 0, 1, 1], [], []>} : vector<16x32xbf16>, vector<32x128xbf16>, vector<16x128xf32> -> vector<16x128xf32>
    %131 = arith.index_cast %128 : i32 to index
    %c0_47 = arith.constant 0 : index
    %132 = vector.load %arg8[%131, %c0_47] : memref<128x128xbf16, #tpu.memory_space<vmem>>, vector<16x128xbf16>
    %133 = arith.extf %132 : vector<16x128xbf16> to vector<16x128xf32>
    %134 = arith.addf %130, %133 : vector<16x128xf32>
    %135 = arith.addf %134, %24 : vector<16x128xf32>
    %136 = math.tanh %135 : vector<16x128xf32>
    %137 = vector.extract_strided_slice %136 {offsets = [0, 0], sizes = [16, 32], strides = [1, 1]} : vector<16x128xf32> to vector<16x32xf32>
    %cst_48 = arith.constant 5.000000e-01 : f32
    %138 = vector.broadcast %cst_48 : f32 to vector<16x32xf32>
    %139 = arith.mulf %138, %137 : vector<16x32xf32>
    %cst_49 = arith.constant 5.000000e-01 : f32
    %140 = vector.broadcast %cst_49 : f32 to vector<16x32xf32>
    %141 = arith.addf %139, %140 : vector<16x32xf32>
    %142 = vector.extract_strided_slice %136 {offsets = [0, 32], sizes = [16, 32], strides = [1, 1]} : vector<16x128xf32> to vector<16x32xf32>
    %cst_50 = arith.constant 5.000000e-01 : f32
    %143 = vector.broadcast %cst_50 : f32 to vector<16x32xf32>
    %144 = arith.mulf %143, %142 : vector<16x32xf32>
    %cst_51 = arith.constant 5.000000e-01 : f32
    %145 = vector.broadcast %cst_51 : f32 to vector<16x32xf32>
    %146 = arith.addf %144, %145 : vector<16x32xf32>
    %147 = vector.extract_strided_slice %136 {offsets = [0, 64], sizes = [16, 32], strides = [1, 1]} : vector<16x128xf32> to vector<16x32xf32>
    %148 = vector.extract_strided_slice %136 {offsets = [0, 96], sizes = [16, 32], strides = [1, 1]} : vector<16x128xf32> to vector<16x32xf32>
    %cst_52 = arith.constant 5.000000e-01 : f32
    %149 = vector.broadcast %cst_52 : f32 to vector<16x32xf32>
    %150 = arith.mulf %149, %148 : vector<16x32xf32>
    %cst_53 = arith.constant 5.000000e-01 : f32
    %151 = vector.broadcast %cst_53 : f32 to vector<16x32xf32>
    %152 = arith.addf %150, %151 : vector<16x32xf32>
    %153 = arith.mulf %146, %121 : vector<16x32xf32>
    %154 = arith.mulf %141, %147 : vector<16x32xf32>
    %155 = arith.addf %153, %154 : vector<16x32xf32>
    %156 = math.tanh %155 : vector<16x32xf32>
    %157 = arith.mulf %152, %156 : vector<16x32xf32>
    %158 = arith.truncf %157 : vector<16x32xf32> to vector<16x32xbf16>
    %159 = arith.index_cast %128 : i32 to index
    %c0_54 = arith.constant 0 : index
    %160 = vector.load %arg7[%159, %c0_54] : memref<128x32xbf16, #tpu.memory_space<vmem>>, vector<16x32xbf16>
    tpu.vector_store %arg7[%159, %c0_54], %158 {strides = array<i32>} : memref<128x32xbf16, #tpu.memory_space<vmem>>, vector<16x32xbf16>,
    %c4_i32 = arith.constant 4 : i32
    %c16_i32_55 = arith.constant 16 : i32
    %161 = arith.muli %c4_i32, %c16_i32_55 : i32
    %162 = tpu.assume_multiple %161, 16 : i32
    %163 = arith.truncf %157 : vector<16x32xf32> to vector<16x32xbf16>
    %cst_56 = arith.constant dense<0.000000e+00> : vector<16x128xf32>
    %164 = tpu.matmul %163, %20, %cst_56 {dimension_numbers = #tpu.dot_dimension_numbers<[1], [0], [0], [1], [0, 0, 1, 1], [], []>} : vector<16x32xbf16>, vector<32x128xbf16>, vector<16x128xf32> -> vector<16x128xf32>
    %165 = arith.index_cast %162 : i32 to index
    %c0_57 = arith.constant 0 : index
    %166 = vector.load %arg8[%165, %c0_57] : memref<128x128xbf16, #tpu.memory_space<vmem>>, vector<16x128xbf16>
    %167 = arith.extf %166 : vector<16x128xbf16> to vector<16x128xf32>
    %168 = arith.addf %164, %167 : vector<16x128xf32>
    %169 = arith.addf %168, %24 : vector<16x128xf32>
    %170 = math.tanh %169 : vector<16x128xf32>
    %171 = vector.extract_strided_slice %170 {offsets = [0, 0], sizes = [16, 32], strides = [1, 1]} : vector<16x128xf32> to vector<16x32xf32>
    %cst_58 = arith.constant 5.000000e-01 : f32
    %172 = vector.broadcast %cst_58 : f32 to vector<16x32xf32>
    %173 = arith.mulf %172, %171 : vector<16x32xf32>
    %cst_59 = arith.constant 5.000000e-01 : f32
    %174 = vector.broadcast %cst_59 : f32 to vector<16x32xf32>
    %175 = arith.addf %173, %174 : vector<16x32xf32>
    %176 = vector.extract_strided_slice %170 {offsets = [0, 32], sizes = [16, 32], strides = [1, 1]} : vector<16x128xf32> to vector<16x32xf32>
    %cst_60 = arith.constant 5.000000e-01 : f32
    %177 = vector.broadcast %cst_60 : f32 to vector<16x32xf32>
    %178 = arith.mulf %177, %176 : vector<16x32xf32>
    %cst_61 = arith.constant 5.000000e-01 : f32
    %179 = vector.broadcast %cst_61 : f32 to vector<16x32xf32>
    %180 = arith.addf %178, %179 : vector<16x32xf32>
    %181 = vector.extract_strided_slice %170 {offsets = [0, 64], sizes = [16, 32], strides = [1, 1]} : vector<16x128xf32> to vector<16x32xf32>
    %182 = vector.extract_strided_slice %170 {offsets = [0, 96], sizes = [16, 32], strides = [1, 1]} : vector<16x128xf32> to vector<16x32xf32>
    %cst_62 = arith.constant 5.000000e-01 : f32
    %183 = vector.broadcast %cst_62 : f32 to vector<16x32xf32>
    %184 = arith.mulf %183, %182 : vector<16x32xf32>
    %cst_63 = arith.constant 5.000000e-01 : f32
    %185 = vector.broadcast %cst_63 : f32 to vector<16x32xf32>
    %186 = arith.addf %184, %185 : vector<16x32xf32>
    %187 = arith.mulf %180, %155 : vector<16x32xf32>
    %188 = arith.mulf %175, %181 : vector<16x32xf32>
    %189 = arith.addf %187, %188 : vector<16x32xf32>
    %190 = math.tanh %189 : vector<16x32xf32>
    %191 = arith.mulf %186, %190 : vector<16x32xf32>
    %192 = arith.truncf %191 : vector<16x32xf32> to vector<16x32xbf16>
    %193 = arith.index_cast %162 : i32 to index
    %c0_64 = arith.constant 0 : index
    %194 = vector.load %arg7[%193, %c0_64] : memref<128x32xbf16, #tpu.memory_space<vmem>>, vector<16x32xbf16>
    tpu.vector_store %arg7[%193, %c0_64], %192 {strides = array<i32>} : memref<128x32xbf16, #tpu.memory_space<vmem>>, vector<16x32xbf16>,
    %c5_i32 = arith.constant 5 : i32
    %c16_i32_65 = arith.constant 16 : i32
    %195 = arith.muli %c5_i32, %c16_i32_65 : i32
    %196 = tpu.assume_multiple %195, 16 : i32
    %197 = arith.truncf %191 : vector<16x32xf32> to vector<16x32xbf16>
    %cst_66 = arith.constant dense<0.000000e+00> : vector<16x128xf32>
    %198 = tpu.matmul %197, %20, %cst_66 {dimension_numbers = #tpu.dot_dimension_numbers<[1], [0], [0], [1], [0, 0, 1, 1], [], []>} : vector<16x32xbf16>, vector<32x128xbf16>, vector<16x128xf32> -> vector<16x128xf32>
    %199 = arith.index_cast %196 : i32 to index
    %c0_67 = arith.constant 0 : index
    %200 = vector.load %arg8[%199, %c0_67] : memref<128x128xbf16, #tpu.memory_space<vmem>>, vector<16x128xbf16>
    %201 = arith.extf %200 : vector<16x128xbf16> to vector<16x128xf32>
    %202 = arith.addf %198, %201 : vector<16x128xf32>
    %203 = arith.addf %202, %24 : vector<16x128xf32>
    %204 = math.tanh %203 : vector<16x128xf32>
    %205 = vector.extract_strided_slice %204 {offsets = [0, 0], sizes = [16, 32], strides = [1, 1]} : vector<16x128xf32> to vector<16x32xf32>
    %cst_68 = arith.constant 5.000000e-01 : f32
    %206 = vector.broadcast %cst_68 : f32 to vector<16x32xf32>
    %207 = arith.mulf %206, %205 : vector<16x32xf32>
    %cst_69 = arith.constant 5.000000e-01 : f32
    %208 = vector.broadcast %cst_69 : f32 to vector<16x32xf32>
    %209 = arith.addf %207, %208 : vector<16x32xf32>
    %210 = vector.extract_strided_slice %204 {offsets = [0, 32], sizes = [16, 32], strides = [1, 1]} : vector<16x128xf32> to vector<16x32xf32>
    %cst_70 = arith.constant 5.000000e-01 : f32
    %211 = vector.broadcast %cst_70 : f32 to vector<16x32xf32>
    %212 = arith.mulf %211, %210 : vector<16x32xf32>
    %cst_71 = arith.constant 5.000000e-01 : f32
    %213 = vector.broadcast %cst_71 : f32 to vector<16x32xf32>
    %214 = arith.addf %212, %213 : vector<16x32xf32>
    %215 = vector.extract_strided_slice %204 {offsets = [0, 64], sizes = [16, 32], strides = [1, 1]} : vector<16x128xf32> to vector<16x32xf32>
    %216 = vector.extract_strided_slice %204 {offsets = [0, 96], sizes = [16, 32], strides = [1, 1]} : vector<16x128xf32> to vector<16x32xf32>
    %cst_72 = arith.constant 5.000000e-01 : f32
    %217 = vector.broadcast %cst_72 : f32 to vector<16x32xf32>
    %218 = arith.mulf %217, %216 : vector<16x32xf32>
    %cst_73 = arith.constant 5.000000e-01 : f32
    %219 = vector.broadcast %cst_73 : f32 to vector<16x32xf32>
    %220 = arith.addf %218, %219 : vector<16x32xf32>
    %221 = arith.mulf %214, %189 : vector<16x32xf32>
    %222 = arith.mulf %209, %215 : vector<16x32xf32>
    %223 = arith.addf %221, %222 : vector<16x32xf32>
    %224 = math.tanh %223 : vector<16x32xf32>
    %225 = arith.mulf %220, %224 : vector<16x32xf32>
    %226 = arith.truncf %225 : vector<16x32xf32> to vector<16x32xbf16>
    %227 = arith.index_cast %196 : i32 to index
    %c0_74 = arith.constant 0 : index
    %228 = vector.load %arg7[%227, %c0_74] : memref<128x32xbf16, #tpu.memory_space<vmem>>, vector<16x32xbf16>
    tpu.vector_store %arg7[%227, %c0_74], %226 {strides = array<i32>} : memref<128x32xbf16, #tpu.memory_space<vmem>>, vector<16x32xbf16>,
    %c6_i32_75 = arith.constant 6 : i32
    %c16_i32_76 = arith.constant 16 : i32
    %229 = arith.muli %c6_i32_75, %c16_i32_76 : i32
    %230 = tpu.assume_multiple %229, 16 : i32
    %231 = arith.truncf %225 : vector<16x32xf32> to vector<16x32xbf16>
    %cst_77 = arith.constant dense<0.000000e+00> : vector<16x128xf32>
    %232 = tpu.matmul %231, %20, %cst_77 {dimension_numbers = #tpu.dot_dimension_numbers<[1], [0], [0], [1], [0, 0, 1, 1], [], []>} : vector<16x32xbf16>, vector<32x128xbf16>, vector<16x128xf32> -> vector<16x128xf32>
    %233 = arith.index_cast %230 : i32 to index
    %c0_78 = arith.constant 0 : index
    %234 = vector.load %arg8[%233, %c0_78] : memref<128x128xbf16, #tpu.memory_space<vmem>>, vector<16x128xbf16>
    %235 = arith.extf %234 : vector<16x128xbf16> to vector<16x128xf32>
    %236 = arith.addf %232, %235 : vector<16x128xf32>
    %237 = arith.addf %236, %24 : vector<16x128xf32>
    %238 = math.tanh %237 : vector<16x128xf32>
    %239 = vector.extract_strided_slice %238 {offsets = [0, 0], sizes = [16, 32], strides = [1, 1]} : vector<16x128xf32> to vector<16x32xf32>
    %cst_79 = arith.constant 5.000000e-01 : f32
    %240 = vector.broadcast %cst_79 : f32 to vector<16x32xf32>
    %241 = arith.mulf %240, %239 : vector<16x32xf32>
    %cst_80 = arith.constant 5.000000e-01 : f32
    %242 = vector.broadcast %cst_80 : f32 to vector<16x32xf32>
    %243 = arith.addf %241, %242 : vector<16x32xf32>
    %244 = vector.extract_strided_slice %238 {offsets = [0, 32], sizes = [16, 32], strides = [1, 1]} : vector<16x128xf32> to vector<16x32xf32>
    %cst_81 = arith.constant 5.000000e-01 : f32
    %245 = vector.broadcast %cst_81 : f32 to vector<16x32xf32>
    %246 = arith.mulf %245, %244 : vector<16x32xf32>
    %cst_82 = arith.constant 5.000000e-01 : f32
    %247 = vector.broadcast %cst_82 : f32 to vector<16x32xf32>
    %248 = arith.addf %246, %247 : vector<16x32xf32>
    %249 = vector.extract_strided_slice %238 {offsets = [0, 64], sizes = [16, 32], strides = [1, 1]} : vector<16x128xf32> to vector<16x32xf32>
    %250 = vector.extract_strided_slice %238 {offsets = [0, 96], sizes = [16, 32], strides = [1, 1]} : vector<16x128xf32> to vector<16x32xf32>
    %cst_83 = arith.constant 5.000000e-01 : f32
    %251 = vector.broadcast %cst_83 : f32 to vector<16x32xf32>
    %252 = arith.mulf %251, %250 : vector<16x32xf32>
    %cst_84 = arith.constant 5.000000e-01 : f32
    %253 = vector.broadcast %cst_84 : f32 to vector<16x32xf32>
    %254 = arith.addf %252, %253 : vector<16x32xf32>
    %255 = arith.mulf %248, %223 : vector<16x32xf32>
    %256 = arith.mulf %243, %249 : vector<16x32xf32>
    %257 = arith.addf %255, %256 : vector<16x32xf32>
    %258 = math.tanh %257 : vector<16x32xf32>
    %259 = arith.mulf %254, %258 : vector<16x32xf32>
    %260 = arith.truncf %259 : vector<16x32xf32> to vector<16x32xbf16>
    %261 = arith.index_cast %230 : i32 to index
    %c0_85 = arith.constant 0 : index
    %262 = vector.load %arg7[%261, %c0_85] : memref<128x32xbf16, #tpu.memory_space<vmem>>, vector<16x32xbf16>
    tpu.vector_store %arg7[%261, %c0_85], %260 {strides = array<i32>} : memref<128x32xbf16, #tpu.memory_space<vmem>>, vector<16x32xbf16>,
    %c7_i32 = arith.constant 7 : i32
    %c16_i32_86 = arith.constant 16 : i32
    %263 = arith.muli %c7_i32, %c16_i32_86 : i32
    %264 = tpu.assume_multiple %263, 16 : i32
    %265 = arith.truncf %259 : vector<16x32xf32> to vector<16x32xbf16>
    %cst_87 = arith.constant dense<0.000000e+00> : vector<16x128xf32>
    %266 = tpu.matmul %265, %20, %cst_87 {dimension_numbers = #tpu.dot_dimension_numbers<[1], [0], [0], [1], [0, 0, 1, 1], [], []>} : vector<16x32xbf16>, vector<32x128xbf16>, vector<16x128xf32> -> vector<16x128xf32>
    %267 = arith.index_cast %264 : i32 to index
    %c0_88 = arith.constant 0 : index
    %268 = vector.load %arg8[%267, %c0_88] : memref<128x128xbf16, #tpu.memory_space<vmem>>, vector<16x128xbf16>
    %269 = arith.extf %268 : vector<16x128xbf16> to vector<16x128xf32>
    %270 = arith.addf %266, %269 : vector<16x128xf32>
    %271 = arith.addf %270, %24 : vector<16x128xf32>
    %272 = math.tanh %271 : vector<16x128xf32>
    %273 = vector.extract_strided_slice %272 {offsets = [0, 0], sizes = [16, 32], strides = [1, 1]} : vector<16x128xf32> to vector<16x32xf32>
    %cst_89 = arith.constant 5.000000e-01 : f32
    %274 = vector.broadcast %cst_89 : f32 to vector<16x32xf32>
    %275 = arith.mulf %274, %273 : vector<16x32xf32>
    %cst_90 = arith.constant 5.000000e-01 : f32
    %276 = vector.broadcast %cst_90 : f32 to vector<16x32xf32>
    %277 = arith.addf %275, %276 : vector<16x32xf32>
    %278 = vector.extract_strided_slice %272 {offsets = [0, 32], sizes = [16, 32], strides = [1, 1]} : vector<16x128xf32> to vector<16x32xf32>
    %cst_91 = arith.constant 5.000000e-01 : f32
    %279 = vector.broadcast %cst_91 : f32 to vector<16x32xf32>
    %280 = arith.mulf %279, %278 : vector<16x32xf32>
    %cst_92 = arith.constant 5.000000e-01 : f32
    %281 = vector.broadcast %cst_92 : f32 to vector<16x32xf32>
    %282 = arith.addf %280, %281 : vector<16x32xf32>
    %283 = vector.extract_strided_slice %272 {offsets = [0, 64], sizes = [16, 32], strides = [1, 1]} : vector<16x128xf32> to vector<16x32xf32>
    %284 = vector.extract_strided_slice %272 {offsets = [0, 96], sizes = [16, 32], strides = [1, 1]} : vector<16x128xf32> to vector<16x32xf32>
    %cst_93 = arith.constant 5.000000e-01 : f32
    %285 = vector.broadcast %cst_93 : f32 to vector<16x32xf32>
    %286 = arith.mulf %285, %284 : vector<16x32xf32>
    %cst_94 = arith.constant 5.000000e-01 : f32
    %287 = vector.broadcast %cst_94 : f32 to vector<16x32xf32>
    %288 = arith.addf %286, %287 : vector<16x32xf32>
    %289 = arith.mulf %282, %257 : vector<16x32xf32>
    %290 = arith.mulf %277, %283 : vector<16x32xf32>
    %291 = arith.addf %289, %290 : vector<16x32xf32>
    %292 = math.tanh %291 : vector<16x32xf32>
    %293 = arith.mulf %288, %292 : vector<16x32xf32>
    %294 = arith.truncf %293 : vector<16x32xf32> to vector<16x32xbf16>
    %295 = arith.index_cast %264 : i32 to index
    %c0_95 = arith.constant 0 : index
    %296 = vector.load %arg7[%295, %c0_95] : memref<128x32xbf16, #tpu.memory_space<vmem>>, vector<16x32xbf16>
    tpu.vector_store %arg7[%295, %c0_95], %294 {strides = array<i32>} : memref<128x32xbf16, #tpu.memory_space<vmem>>, vector<16x32xbf16>,
    %c8_i32 = arith.constant 8 : i32
    %297 = arith.index_cast %arg0 : i32 to index
    %c0_96 = arith.constant 0 : index
    %c0_97 = arith.constant 0 : index
    %298 = vector.load %arg5[%297, %c0_96, %c0_97] : memref<10x16x32xf32, #tpu.memory_space<vmem>>, vector<1x16x32xf32>
    %299 = vector.shape_cast %298 : vector<1x16x32xf32> to vector<16x32xf32>
    %300 = vector.shape_cast %293 : vector<16x32xf32> to vector<1x16x32xf32>
    tpu.vector_store %arg5[%297, %c0_96, %c0_97], %300 {strides = array<i32>} : memref<10x16x32xf32, #tpu.memory_space<vmem>>, vector<1x16x32xf32>,
    %301 = arith.index_cast %arg0 : i32 to index
    %c0_98 = arith.constant 0 : index
    %c0_99 = arith.constant 0 : index
    %302 = vector.load %arg6[%301, %c0_98, %c0_99] : memref<10x16x32xf32, #tpu.memory_space<vmem>>, vector<1x16x32xf32>
    %303 = vector.shape_cast %302 : vector<1x16x32xf32> to vector<16x32xf32>
    %304 = vector.shape_cast %291 : vector<16x32xf32> to vector<1x16x32xf32>
    tpu.vector_store %arg6[%301, %c0_98, %c0_99], %304 {strides = array<i32>} : memref<10x16x32xf32, #tpu.memory_space<vmem>>, vector<1x16x32xf32>,
    return
  }
  func.func @transform_0(%arg0: i32) -> (i32, i32) {
    %c0_i32 = arith.constant 0 : i32
    %c0_i32_0 = arith.constant 0 : i32
    %c0_i32_1 = arith.constant 0 : i32
    return %c0_i32, %c0_i32_0 : i32, i32
  }
  func.func @transform_1(%arg0: i32) -> (i32, i32, i32) {
    %c0_i32 = arith.constant 0 : i32
    %c0_i32_0 = arith.constant 0 : i32
    %c0_i32_1 = arith.constant 0 : i32
    return %arg0, %c0_i32, %c0_i32_0 : i32, i32, i32
  }
  func.func @transform_2(%arg0: i32) -> (i32, i32, i32) {
    %c0_i32 = arith.constant 0 : i32
    %c0_i32_0 = arith.constant 0 : i32
    %c0_i32_1 = arith.constant 0 : i32
    return %arg0, %c0_i32, %c0_i32_0 : i32, i32, i32
  }
  func.func @transform_3(%arg0: i32) -> (i32, i32, i32) {
    %c0_i32 = arith.constant 0 : i32
    %c0_i32_0 = arith.constant 0 : i32
    %c0_i32_1 = arith.constant 0 : i32
    return %arg0, %c0_i32, %c0_i32_0 : i32, i32, i32
  }
  func.func @transform_4(%arg0: i32) -> (i32, i32, i32) {
    %c0_i32 = arith.constant 0 : i32
    %c0_i32_0 = arith.constant 0 : i32
    %c0_i32_1 = arith.constant 0 : i32
    %c0_i32_2 = arith.constant 0 : i32
    return %c0_i32, %c0_i32_0, %c0_i32_1 : i32, i32, i32
  }
  func.func @transform_5(%arg0: i32) -> (i32, i32, i32) {
    %c0_i32 = arith.constant 0 : i32
    %c0_i32_0 = arith.constant 0 : i32
    %c0_i32_1 = arith.constant 0 : i32
    %c0_i32_2 = arith.constant 0 : i32
    return %c0_i32, %c0_i32_0, %c0_i32_1 : i32, i32, i32
  }
}

</mosaic_0001>

<bundles_post_ra>
// kernel: deep_lstm_forward.1
= control target key start
LH: loop header
LB: loop body
LE: loop exit
PB: predicated region body
PF: predicated region fallthrough
CT: control target
= control target key end

     0   :  { %11 = vsyncpa [#allocation5], 0  ;;  %s3073_s0 = inlined_call_operand.vmem [shape: bf16[128,32], index: 0, kind: input, shape index: {}]   ;;  %s3074_s1 = inlined_call_operand.hbm [shape: bf16[10,32,128], index: 1, kind: input, shape index: {}]   ;;  %s3075_s2 = inlined_call_operand.hbm [shape: bf16[10,32,128], index: 2, kind: input, shape index: {}]   ;;  %s3076_s3 = inlined_call_operand.vmem [shape: f32[10,1,128], index: 3, kind: input, shape index: {}]   ;;  %s3077_s4 = inlined_call_operand.vmem [shape: f32[10,16,32], index: 4, kind: output, shape index: {0}]   ;;  %s3078_s5 = inlined_call_operand.vmem [shape: f32[10,16,32], index: 5, kind: output, shape index: {1}]  }
   0x1   :  { %13 = vsyncpa [#allocation5 + $0x1], 0 }
   0x2   :  { %14 = vsyncpa [#allocation7], 0 }
   0x3   :  { %16 = vsyncpa [#allocation7 + $0x1], 0  ;;  %s2589_s18 = smov 0   ;;  %s2591_s19 = smov 0  }
   0x4   :  { %s2593_s20 = smov 0   ;;  %s2595_s21 = smov 0  }
   0x5 LB: > { %s2608_s22 = sadd.s32 4294967295, %s2548_s21   ;;  %s2611_s23 = sadd.s32 1, %s2548_s21   ;;  %s2548_s21 = sphi %s2595_s21, %s3088_s21   ;;  %s2544_s20 = sphi %s2593_s20, %s3087_s20   ;;  %s2540_s19 = sphi %s2591_s19, %s3086_s19   ;;  %s2536_s18 = sphi %s2589_s18, %s3085_s18  }
   0x6   : > { %s47_s24 = ssub.s32 %s2548_s21, %s2611_s23  ;;  %s50_s25 = sadd.s32 1, %s2544_s20 }
   0x7   : > { %p48_p0 = scmp.eq.s32.totalorder %s47_s24, 0  ;;  %p57_p1 = scmp.ne.s32.totalorder %s2544_s20, %s2540_s19 }
   0x8   : > { %p58_p2 = scmp.eq.s32.totalorder %s2548_s21, 0  ;;  %p63_p3 = scmp.ne.s32.totalorder %s2540_s19, %s2536_s18 }
   0x9   : > { %s2621_s26 = scalar_select %p48_p0, %s2544_s20, %s50_s25  }
   0xa   : > { %p59_p4 = por %p58_p2, %p57_p1  ;;  %p64_p5 = scmp.eq.s32.totalorder %s2608_s22, 0 }
   0xb   : > { %p2316_p6 = scmp.lt.s32.totalorder %s2548_s21, 10  ;;  %s2630_s28 = sand.u32 1, %s2544_s20  }
   0xc   : > { %p2625_p7 = por %p64_p5, %p63_p3  ;;  %s1862_s29 = sshll.u32 %s2630_s28, 4 }
   0xd   : > { %s1973_s30 = sshll.u32 %s2548_s21, 8  ;;  %s188_s9 = scalar_lea.vmem [#allocation4], %s1862_s29 }
   0xe   : > { %s3080_s27 = scalar_select %p2625_p7, 1, 0 }
   0xf   : > { %s2639_s8 = scalar_lea.hbm %s3074_s1, %s1973_s30  ;;  %s195_s10 = sshll.u32 %s188_s9, 4  ;;  %s2643_s10 = int_to_ptr.vmem [resolvable:$true] %s195_s10 }
  0x10   : > { %p2645_p8 = pnand %p2316_p6, %p59_p4  ;;  %s185_s12 = scalar_lea.sflag [#allocation5], %s2630_s28 }
  0x11   : > { %s2454_s13 = scalar_lea.hbm %s2639_s8, 256  ;;  %s2459_s16 = scalar_lea.hbm %s3074_s1, 2560 }
  0x12   : > { %p2455_p10 = scmp.ne.s32.totalorder %s2639_s8, %s2454_s13  ;;  %p2456_p11 = pneg %p2645_p8 }
  0x13   : > { %p2460_p0 = scmp.lt.s32.totalorder %s2639_s8, %s3074_s1  ;;  %p2461_p1 = scmp.lt.s32.totalorder %s2459_s16, %s2454_s13 }
  0x14   : > { %p2457_p12 = pnand %p2456_p11, %p2455_p10 }
  0x15   : > { %p2462_p2 = por %p2461_p1, %p2460_p0 }
  0x16   : > { %p2458_p13 = pneg %p2457_p12 }
  0x18   : > { %p2463_p3 = pnand %p2462_p2, %p2458_p13 }
  0x1a   : > { %2466 = shalt.err (!%p2463_p3)
}
  0x1b   : > { %s2467_s24 = scalar_lea.vmem %s2643_s10, 256  ;;  %s2550_s25 = smov [#allocation4]  }
  0x1c   : > { %p2468_p4 = scmp.ne.s32.totalorder %s2643_s10, %s2467_s24  ;;  %s2472_s6 = sshll.u32 %s2550_s25, 4  ;;  %s2473_s6 = int_to_ptr.vmem [resolvable:$false] %s2472_s6 }
  0x1d   : > { %s2474_s7 = scalar_lea.vmem %s2473_s6, 512  ;;  %p2475_p10 = scmp.lt.s32.totalorder %s2643_s10, %s2473_s6 }
  0x1e   : > { %p2470_p5 = pnand %p2468_p4, %p2456_p11  ;;  %p2476_p12 = scmp.lt.s32.totalorder %s2474_s7, %s2467_s24 }
  0x20   : > { %p2471_p6 = pneg %p2470_p5  ;;  %p2477_p9 = por %p2476_p12, %p2475_p10 }
  0x22   : > { %p2478_p0 = pnand %p2477_p9, %p2471_p6 }
  0x24   : > { %2481 = shalt.err (!%p2478_p0)
}
  0x25   : > { %s2551_s9 = smov 64   ;;  %s2552_s13 = smov 4  }
  0x26   : > { %2312 = dma.hbm_to_vmem [thread:$0]  (!%p2645_p8), %s2639_s8, 256, %s2643_s10, %s185_s12, %s2551_s9, %s2551_s9, %s2552_s13  }
  0x27   : > { %p230_p9 = scmp.lt.s32.totalorder %s2548_s21, 11  ;;  %s2686_s16 = scalar_lea.hbm %s3075_s2, %s1973_s30 }
  0x28   : > { %p3082_p13 = scmp.ge.s32.totalorder %s2548_s21, 1  ;;  %s209_s18 = scalar_lea.vmem [#allocation6], %s1862_s29 }
  0x29   : > { %s216_s24 = sshll.u32 %s209_s18, 4  ;;  %s206_s8 = scalar_lea.sflag [#allocation7], %s2630_s28  ;;  %s2696_s24 = int_to_ptr.vmem [resolvable:$true] %s216_s24 }
  0x2a   : > { %p2690_p1 = pnand %p3082_p13, %p230_p9  ;;  %s2482_s10 = scalar_lea.hbm %s2686_s16, 256 }
  0x2b   : > { %p2483_p2 = scmp.ne.s32.totalorder %s2686_s16, %s2482_s10  ;;  %s2487_s12 = scalar_lea.hbm %s3075_s2, 2560 }
  0x2c   : > { %p2488_p5 = scmp.lt.s32.totalorder %s2686_s16, %s3075_s2  ;;  %p2489_p6 = scmp.lt.s32.totalorder %s2487_s12, %s2482_s10 }
  0x2d   : > { %p2485_p3 = pnand %p2483_p2, %p2456_p11 }
  0x2e   : > { %p2490_p10 = por %p2489_p6, %p2488_p5 }
  0x2f   : > { %p2486_p4 = pneg %p2485_p3 }
  0x31   : > { %p2491_p12 = pnand %p2490_p10, %p2486_p4 }
  0x33   : > { %2494 = shalt.err (!%p2491_p12)
}
  0x34   : > { %s2495_s28 = scalar_lea.vmem %s2696_s24, 256  ;;  %s2553_s29 = smov [#allocation6]  }
  0x35   : > { %p2496_p0 = scmp.ne.s32.totalorder %s2696_s24, %s2495_s28  ;;  %s2500_s7 = sshll.u32 %s2553_s29, 4  ;;  %s2501_s7 = int_to_ptr.vmem [resolvable:$false] %s2500_s7 }
  0x36   : > { %s2502_s14 = scalar_lea.vmem %s2501_s7, 512  ;;  %p2503_p2 = scmp.lt.s32.totalorder %s2696_s24, %s2501_s7 }
  0x37   : > { %p2498_p9 = pnand %p2496_p0, %p2456_p11  ;;  %p2504_p3 = scmp.lt.s32.totalorder %s2502_s14, %s2495_s28 }
  0x39   : > { %p2499_p13 = pneg %p2498_p9  ;;  %p2505_p7 = por %p2504_p3, %p2503_p2 }
  0x3b   : > { %p2506_p5 = pnand %p2505_p7, %p2499_p13 }
  0x3d   : > { %2509 = shalt.err (!%p2506_p5)
}
  0x3e   : > { %2315 = dma.hbm_to_vmem [thread:$0]  (!%p2645_p8), %s2686_s16, 256, %s2696_s24, %s206_s8, %s2551_s9, %s2551_s9, %s2552_s13  }
  0x3f   : > { %234 = sbr.rel (%p2690_p1) target bundleno = 6116 (0x17e4), region = 36  ;;  %s236_s15 = sand.u32 (!%p2690_p1), 1, %s2540_s19  }
  0x40   : > { %s1869_s18 = sshll.u32 (!%p2690_p1), %s236_s15, 4  ;;  %s237_s10 = scalar_lea.sflag (!%p2690_p1), [#allocation5], %s236_s15 }
  0x41   : > { %s2727_s21 = scalar_lea.vmem (!%p2690_p1), [#allocation4], %s1869_s18  ;;  %p3084_p7 = scmp.ne.s32.totalorder (!%p2690_p1), %s3080_s27, 0 }
  0x44   : > { %2527 = dma.done.wait (%p3084_p7), %s237_s10, 256  }
  0x45   : > { %2529 = vsyncadd (%p3084_p7), %s237_s10, 4294967040  ;;  %s246_s11 = scalar_lea.sflag [#allocation7], %s236_s15  ;;  %s2733_s30 = scalar_lea.vmem [#allocation6], %s1869_s18 }
  0x46   : > { %2531 = dma.done.wait (%p3084_p7), %s246_s11, 256  }
  0x47   : > { %2533 = vsyncadd (%p3084_p7), %s246_s11, 4294967040  ;;  %p279_p8 = scmp.lt.s32.totalorder %s2608_s22, 9  ;;  %p1871_p11 = scmp.ne.s32.totalorder %s2608_s22, 0 }
  0x49   : > { %s2741_s9 = scalar_select %p279_p8, %s2608_s22, 9 }
  0x4a   : > { %286 = sbr.rel (%p1871_p11) target bundleno = 298 (0x12a), region = 48 }
  0x4b   : > { %s281_s17 = scalar_lea.vmem %s3076_s3, %s2741_s9 }
  0x4f   : > { %v2356_v0 = vld [vmem:[%s2727_s21 + $0x8] sm:$0xff]   ;;  %v2357_v1 = vld [vmem:[%s2727_s21] sm:$0xff]   ;;  %vm359_vm0 = vcmask 261120  }
  0x50   : > { %2193 = vmatprep.subr.bf16.mxu0 %v2356_v0  ;;  %2297 = vmatprep.subr.bf16.mxu1 %v2356_v0  ;;  %v2358_v2 = vld [vmem:[%s3073_s0] sm:$0xff]   ;;  %v2360_v4 = vld [vmem:[%s3073_s0 + $0x8] sm:$0xff]   ;;  %v2362_v6 = vld [vmem:[%s3073_s0 + $0x10] sm:$0xff]  }
  0x51   : > { %2194 = vmatpush3.bf16.msra.mxu0 %v2356_v0  ;;  %2299 = vmatpush3.bf16.msra.mxu1 %v2356_v0  ;;  %v2359_v3 = vld [vmem:[%s3073_s0 + $0x20] sm:$0xff]   ;;  %v2361_v5 = vld [vmem:[%s3073_s0 + $0x28] sm:$0xff]   ;;  %v2363_v7 = vld [vmem:[%s3073_s0 + $0x30] sm:$0xff]  }
  0x52   : > { %2195 = vmatprep.subr.bf16.mxu0 %v2357_v1  ;;  %2298 = vmatprep.subr.bf16.mxu1 %v2357_v1  ;;  %v2364_v8 = vld [vmem:[%s3073_s0 + $0x18] sm:$0xff]  }
  0x53   : > { %2197 = vmatprep.mubr.msk.bf16.mxu0 %vm359_vm0, %v2358_v2  ;;  %2205 = vmatprep.mubr.msk.bf16.mxu1 %vm359_vm0, %v2359_v3  ;;  %v2365_v9 = vld [vmem:[%s3073_s0 + $0x38] sm:$0xff]  }
  0x55   : > { %2196 = vmatpush3.bf16.msra.mxu0 %v2357_v1  ;;  %2300 = vmatpush3.bf16.msra.mxu1 %v2357_v1 }
  0x58   : > { %2198 = vmatmul.mubr.msk.bf16.vlgmr.msra.gmra.mxu0 %vm359_vm0, %v2360_v4  ;;  %2206 = vmatmul.mubr.msk.bf16.vlgmr.msra.gmra.mxu1 %vm359_vm0, %v2361_v5 }
  0x59   : > { %2201 = vmatprep.mubr.msk.bf16.mxu0 %vm359_vm0, %v2362_v6  ;;  %2209 = vmatprep.mubr.msk.bf16.mxu1 %vm359_vm0, %v2363_v7 }
  0x60   : > { %2202 = vmatmul.mubr.msk.bf16.gmra.mxu0 %vm359_vm0, %v2364_v8  ;;  %2210 = vmatmul.mubr.msk.bf16.gmra.mxu1 %vm359_vm0, %v2365_v9 }
 0x118   : > { %v2199_v10 = vpop.f32.mrf.mxu0  ;;  %v2207_v11 = vpop.f32.mrf.mxu1 }
 0x11a   : > { %v418_v12 = vpop.f32.mrf.mxu0  ;;  %v450_v13 = vpop.f32.mrf.mxu1 }
 0x11c   : > { %v2200_v14 = vpop.f32.mrf.mxu0  ;;  %v2208_v15 = vpop.f32.mrf.mxu1 }
 0x11d   : > { %v2031_v16 = vpack.c.bf16 %v2200_v14, %v2199_v10  ;;  %v2051_v17 = vpack.c.bf16 %v2208_v15, %v2207_v11 }
 0x11e   : > { %v421_v18 = vpop.f32.mrf.mxu0  ;;  %v453_v19 = vpop.f32.mrf.mxu1 }
 0x11f   : > { %2135 = vst [vmem:[#allocation3] sm:$0xff] %v2031_v16   ;;  %2139 = vst [vmem:[#allocation3 + $0x20] sm:$0xff] %v2051_v17   ;;  %v2026_v20 = vpack.c.bf16 %v421_v18, %v418_v12  ;;  %v2046_v21 = vpack.c.bf16 %v453_v19, %v450_v13 }
 0x120   : > { %v2203_v22 = vpop.f32.mrf.mxu0  ;;  %v2211_v23 = vpop.f32.mrf.mxu1 }
 0x121   : > { %2027 = vst [vmem:[#allocation3 + $0x30] sm:$0xff] %v2026_v20   ;;  %2138 = vst [vmem:[#allocation3 + $0x8] sm:$0xff] %v2046_v21  }
 0x122   : > { %v434_v24 = vpop.f32.mrf.mxu0  ;;  %v466_v25 = vpop.f32.mrf.mxu1 }
 0x124   : > { %v2204_v26 = vpop.f32.mrf.mxu0  ;;  %v2212_v27 = vpop.f32.mrf.mxu1 }
 0x125   : > { %v2041_v28 = vpack.c.bf16 %v2204_v26, %v2203_v22  ;;  %v2061_v29 = vpack.c.bf16 %v2212_v27, %v2211_v23 }
 0x126   : > { %v437_v30 = vpop.f32.mrf.mxu0  ;;  %v469_v31 = vpop.f32.mrf.mxu1 }
 0x127   : > { %2137 = vst [vmem:[#allocation3 + $0x10] sm:$0xff] %v2041_v28   ;;  %2141 = vst [vmem:[#allocation3 + $0x38] sm:$0xff] %v2061_v29   ;;  %v2036_v32 = vpack.c.bf16 %v437_v30, %v434_v24  ;;  %v2056_v33 = vpack.c.bf16 %v469_v31, %v466_v25 }
 0x129   : > { %2136 = vst [vmem:[#allocation3 + $0x18] sm:$0xff] %v2036_v32   ;;  %2140 = vst [vmem:[#allocation3 + $0x28] sm:$0xff] %v2056_v33  }
 0x12a PF: > { %p1906_p1 = scmp.le.s32.totalorder %s2608_s22, 0 }
 0x12c   : > { %564 = sbr.rel (%p1906_p1) target bundleno = 524 (0x20c), region = 52 }
 0x131   : > { %v2366_v34 = vld [vmem:[%s2727_s21 + $0x8] sm:$0xff]   ;;  %v2367_v35 = vld [vmem:[%s2727_s21] sm:$0xff]   ;;  %vm637_vm1 = vcmask 261120  }
 0x132   : > { %2213 = vmatprep.subr.bf16.mxu0 %v2366_v34  ;;  %2301 = vmatprep.subr.bf16.mxu1 %v2366_v34  ;;  %v2368_v36 = vld [vmem:[#allocation2] sm:$0xff]   ;;  %v2370_v38 = vld [vmem:[#allocation2 + $0x8] sm:$0xff]   ;;  %v2372_v40 = vld [vmem:[#allocation2 + $0x10] sm:$0xff]  }
 0x133   : > { %2214 = vmatpush3.bf16.msra.mxu0 %v2366_v34  ;;  %2303 = vmatpush3.bf16.msra.mxu1 %v2366_v34  ;;  %v2369_v37 = vld [vmem:[#allocation2 + $0x20] sm:$0xff]   ;;  %v2371_v39 = vld [vmem:[#allocation2 + $0x28] sm:$0xff]   ;;  %v2373_v41 = vld [vmem:[#allocation2 + $0x30] sm:$0xff]  }
 0x134   : > { %2215 = vmatprep.subr.bf16.mxu0 %v2367_v35  ;;  %2302 = vmatprep.subr.bf16.mxu1 %v2367_v35  ;;  %v2374_v42 = vld [vmem:[#allocation2 + $0x18] sm:$0xff]  }
 0x135   : > { %2217 = vmatprep.mubr.msk.bf16.mxu0 %vm637_vm1, %v2368_v36  ;;  %2225 = vmatprep.mubr.msk.bf16.mxu1 %vm637_vm1, %v2369_v37  ;;  %v2375_v43 = vld [vmem:[#allocation2 + $0x38] sm:$0xff]  }
 0x137   : > { %2216 = vmatpush3.bf16.msra.mxu0 %v2367_v35  ;;  %2304 = vmatpush3.bf16.msra.mxu1 %v2367_v35 }
 0x13a   : > { %2218 = vmatmul.mubr.msk.bf16.vlgmr.msra.gmra.mxu0 %vm637_vm1, %v2370_v38  ;;  %2226 = vmatmul.mubr.msk.bf16.vlgmr.msra.gmra.mxu1 %vm637_vm1, %v2371_v39 }
 0x13b   : > { %2221 = vmatprep.mubr.msk.bf16.mxu0 %vm637_vm1, %v2372_v40  ;;  %2229 = vmatprep.mubr.msk.bf16.mxu1 %vm637_vm1, %v2373_v41 }
 0x142   : > { %2222 = vmatmul.mubr.msk.bf16.gmra.mxu0 %vm637_vm1, %v2374_v42  ;;  %2230 = vmatmul.mubr.msk.bf16.gmra.mxu1 %vm637_vm1, %v2375_v43 }
 0x1fa   : > { %v2219_v44 = vpop.f32.mrf.mxu0  ;;  %v2227_v45 = vpop.f32.mrf.mxu1 }
 0x1fc   : > { %v696_v46 = vpop.f32.mrf.mxu0  ;;  %v728_v47 = vpop.f32.mrf.mxu1 }
 0x1fe   : > { %v2220_v48 = vpop.f32.mrf.mxu0  ;;  %v2228_v49 = vpop.f32.mrf.mxu1 }
 0x1ff   : > { %v2071_v50 = vpack.c.bf16 %v2220_v48, %v2219_v44  ;;  %v2091_v51 = vpack.c.bf16 %v2228_v49, %v2227_v45 }
 0x200   : > { %v699_v52 = vpop.f32.mrf.mxu0  ;;  %v731_v53 = vpop.f32.mrf.mxu1 }
 0x201   : > { %2142 = vst [vmem:[#allocation3] sm:$0xff] %v2071_v50   ;;  %2146 = vst [vmem:[#allocation3 + $0x20] sm:$0xff] %v2091_v51   ;;  %v2066_v54 = vpack.c.bf16 %v699_v52, %v696_v46  ;;  %v2086_v55 = vpack.c.bf16 %v731_v53, %v728_v47 }
 0x202   : > { %v2223_v56 = vpop.f32.mrf.mxu0  ;;  %v2231_v57 = vpop.f32.mrf.mxu1 }
 0x203   : > { %2067 = vst [vmem:[#allocation3 + $0x30] sm:$0xff] %v2066_v54   ;;  %2145 = vst [vmem:[#allocation3 + $0x8] sm:$0xff] %v2086_v55  }
 0x204   : > { %v712_v58 = vpop.f32.mrf.mxu0  ;;  %v744_v59 = vpop.f32.mrf.mxu1 }
 0x206   : > { %v2224_v60 = vpop.f32.mrf.mxu0  ;;  %v2232_v61 = vpop.f32.mrf.mxu1 }
 0x207   : > { %v2081_v62 = vpack.c.bf16 %v2224_v60, %v2223_v56  ;;  %v2101_v63 = vpack.c.bf16 %v2232_v61, %v2231_v57 }
 0x208   : > { %v715_v0 = vpop.f32.mrf.mxu0  ;;  %v747_v1 = vpop.f32.mrf.mxu1 }
 0x209   : > { %2144 = vst [vmem:[#allocation3 + $0x10] sm:$0xff] %v2081_v62   ;;  %2148 = vst [vmem:[#allocation3 + $0x38] sm:$0xff] %v2101_v63   ;;  %v2076_v2 = vpack.c.bf16 %v715_v0, %v712_v58  ;;  %v2096_v3 = vpack.c.bf16 %v747_v1, %v744_v59 }
 0x20b   : > { %2143 = vst [vmem:[#allocation3 + $0x18] sm:$0xff] %v2076_v2   ;;  %2147 = vst [vmem:[#allocation3 + $0x28] sm:$0xff] %v2096_v3  }
 0x20c PF: > { %v2794_v4 = vld [vmem:[%s2733_s30 + $0x8] sm:$0xff]   ;;  %v2554_v5 = vmov 0.0   ;;  %v2800_v6 = vld [vmem:[%s2733_s30] sm:$0xff]   ;;  %vm2555_vm2 = vmmov 0   ;;  %p839_p4 = scmp.ge.s32.totalorder %s2608_s22, 6  ;;  %s1941_s21 = sadd.s32 4294967294, %s2608_s22 }
 0x20d   : > { %2233 = vmatprep.subr.bf16.mxu0 %v2554_v5  ;;  %2241 = vmatprep.subr.bf16.mxu1 %v2554_v5  ;;  %p841_p6 = scmp.gt.s32.totalorder %s1941_s21, 0  ;;  %vm885_vm3 = vcmask 261120   ;;  %s2556_s29 = smov 32   ;;  %v2104_v12 = vld [vmem:[#allocation3 + $0x30] sm:$0xff]   ;;  %v2837_v14 = vld [vmem:[%s281_s17] ss:$0 sm:$0xff] }
 0x20e   : > { %2234 = vmatpush3.bf16.msra.mxu0 %v2794_v4  ;;  %2237 = vmatprep.mubr.msk.bf16.mxu0 %vm2555_vm2, %v2554_v5  ;;  %s2379_s28 = scalar_select %p839_p4, 255, 0  ;;  %v2105_v13 = vunpack.c.l.bf16 %v2104_v12  ;;  %v2106_v17 = vunpack.c.h.bf16 %v2104_v12  ;;  %v2108_v50 = vld [vmem:[#allocation3] sm:$0xff]   ;;  %vm992_vm4 = vcmask 257024  }
 0x20f   : > { %2235 = vmatprep.subr.bf16.mxu0 %v2554_v5  ;;  %2242 = vmatpush3.bf16.msra.mxu1 %v2794_v4  ;;  %s3090_s21 = smov (!%p841_p6, %s1941_s21), 0  ;;  %s2557_s15 = smov 64   ;;  %v2109_v51 = vunpack.c.l.bf16 %v2108_v50  ;;  %v2110_v54 = vunpack.c.h.bf16 %v2108_v50 }
 0x210   : > { %2243 = vmatprep.subr.bf16.mxu1 %v2554_v5  ;;  %2245 = vmatprep.mubr.msk.bf16.mxu1 %vm2555_vm2, %v2554_v5  ;;  %s1942_s30 = sshll.u32 %s3090_s21, 4  ;;  %s2558_s9 = smov 96  }
 0x211   : > { %s844_s8 = scalar_lea.vmem %s3077_s4, %s1942_s30  ;;  %s852_s6 = scalar_lea.vmem %s3078_s5, %s1942_s30 }
 0x212   : > { %2236 = vmatpush3.bf16.msra.mxu0 %v2800_v6  ;;  %v2380_v7 = vld [vmem:[%s844_s8] sm:%s2379_s28]  ;;  %v2383_v8 = vld [vmem:[%s844_s8 + $0x8] sm:%s2379_s28]  ;;  %s1970_s17 = sshll.u32 %s2608_s22, 4 }
 0x213   : > { %2244 = vmatpush3.bf16.msra.mxu1 %v2800_v6  ;;  %2249 = vmatprep.subr.bf16.mxu0 %v2554_v5  ;;  %v868_v9 = vpack.c.bf16 %v2383_v8, %v2380_v7  ;;  %v2386_v10 = vld [vmem:[%s852_s6] sm:%s2379_s28]  ;;  %v2389_v11 = vld [vmem:[%s852_s6 + $0x8] sm:%s2379_s28]  ;;  %s1760_s11 = scalar_lea.vmem %s3077_s4, %s1970_s17  ;;  %s1771_s21 = scalar_lea.vmem %s3078_s5, %s1970_s17 }
 0x214   : > { %2257 = vmatprep.subr.bf16.mxu1 %v2554_v5  ;;  %940 = vrot.lane.b32.xlu1 %v2386_v10, %s2556_s29 }
 0x215   : > { %2238 = vmatmul.mubr.msk.bf16.vlgmr.msra.gmra.mxu0 %vm885_vm3, %v868_v9 }
 0x216   : > { %2250 = vmatpush3.bf16.msra.mxu0 %v2794_v4  ;;  %2253 = vmatprep.mubr.msk.bf16.mxu0 %vm2555_vm2, %v2554_v5 }
 0x217   : > { %2251 = vmatprep.subr.bf16.mxu0 %v2554_v5 }
 0x218   : > { %942 = vrot.lane.b32.xlu1 %v2389_v11, %s2556_s29 }
 0x21a   : > { %2252 = vmatpush3.bf16.msra.mxu0 %v2800_v6 }
 0x21b   : > { %2265 = vmatprep.subr.bf16.mxu0 %v2554_v5 }
 0x286   : > { %v941_v34 = vpop.permute.xlu1 %940 }
 0x28a   : > { %v943_v36 = vpop.permute.xlu1 %942 }
 0x2d5   : > { %v923_v15 = vpop.f32.mrf.mxu0 }
 0x2d6   : > { %v924_v16 = vadd.f32 %v2105_v13, %v923_v15 }
 0x2d7   : > { %v2239_v18 = vpop.f32.mrf.mxu0 }
 0x2d8   : > { %v930_v19 = vadd.f32 %v2837_v14, %v924_v16 }
 0x2d9   : > { %v926_v20 = vpop.f32.mrf.mxu0 }
 0x2da   : > { %2390 = vtanh.f32 %v930_v19  ;;  %v927_v21 = vadd.f32 %v2106_v17, %v926_v20 }
 0x2db   : > { %v2240_v22 = vpop.f32.mrf.mxu0 }
 0x2dc   : > { %v931_v23 = vadd.f32 %v2837_v14, %v927_v21 }
 0x2de   : > { %2392 = vtanh.f32 %v931_v23 }
 0x2e7   : > { %v2391_v24 = vpop.eup %2390 }
 0x2e8   : > { %950 = vrot.lane.b32.xlu0 %v2391_v24, %s2557_s15  ;;  %v934_v26 = vmul.f32 0.5, %v2391_v24 }
 0x2ea   : > { %v936_v27 = vadd.f32 0.5, %v934_v26 }
 0x2eb   : > { %v2393_v25 = vpop.eup %2392 }
 0x2ec   : > { %952 = vrot.lane.b32.xlu0 %v2393_v25, %s2557_s15  ;;  %v935_v28 = vmul.f32 0.5, %v2393_v25  ;;  %v946_v35 = vmul.f32 %v941_v34, %v936_v27  ;;  %v2112_v25 = vld [vmem:[#allocation3 + $0x18] sm:$0xff]  }
 0x2ed   : > { %v2113_v26 = vunpack.c.l.bf16 %v2112_v25 }
 0x2ee   : > { %v937_v31 = vadd.f32 0.5, %v935_v28 }
 0x2f0   : > { %v947_v39 = vmul.f32 %v943_v36, %v937_v31 }
 0x35a   : > { %v951_v29 = vpop.permute.xlu0 %950 }
 0x35b   : > { %v956_v30 = vmul.f32 %v951_v29, %v936_v27  ;;  %v2114_v29 = vunpack.c.h.bf16 %v2112_v25 }
 0x35d   : > { %960 = vrot.lane.b32.xlu0 %v956_v30, %s2556_s29 }
 0x35e   : > { %v953_v32 = vpop.permute.xlu0 %952 }
 0x35f   : > { %v957_v33 = vmul.f32 %v953_v32, %v937_v31 }
 0x361   : > { %962 = vrot.lane.b32.xlu1 %v957_v33, %s2556_s29 }
 0x3cf   : > { %v961_v37 = vpop.permute.xlu0 %960 }
 0x3d0   : > { %v966_v38 = vadd.f32 %v961_v37, %v946_v35 }
 0x3d2   : > { %2394 = vtanh.f32 %v966_v38 }
 0x3d3   : > { %v963_v40 = vpop.permute.xlu1 %962 }
 0x3d4   : > { %v967_v41 = vadd.f32 %v963_v40, %v947_v39 }
 0x3d6   : > { %2396 = vtanh.f32 %v967_v41 }
 0x3df   : > { %v2395_v42 = vpop.eup %2394 }
 0x3e0   : > { %972 = vrot.lane.b32.xlu0 %v2395_v42, %s2557_s15 }
 0x3e3   : > { %v2397_v43 = vpop.eup %2396 }
 0x3e4   : > { %974 = vrot.lane.b32.xlu1 %v2397_v43, %s2557_s15 }
 0x452   : > { %v973_v44 = vpop.permute.xlu0 %972 }
 0x453   : > { %v2847_v46 = vmul.f32 %v973_v44, %v936_v27 }
 0x456   : > { %v975_v45 = vpop.permute.xlu1 %974 }
 0x457   : > { %v2849_v47 = vmul.f32 %v975_v45, %v937_v31 }
 0x459   : > { %v980_v48 = vpack.c.bf16 %v2849_v47, %v2847_v46 }
 0x45b   : > { %1000 = vrot.lane.b32.xlu0 %v980_v48, %s2556_s29 }
 0x4cd   : > { %v1001_v49 = vpop.permute.xlu0 %1000 }
 0x4ce   : > { %2246 = vmatmul.mubr.msk.bf16.vlgmr.msra.gmra.mxu1 %vm885_vm3, %v1001_v49 }
 0x4cf   : > { %2258 = vmatpush3.bf16.msra.mxu1 %v2794_v4  ;;  %2261 = vmatprep.mubr.msk.bf16.mxu1 %vm2555_vm2, %v2554_v5 }
 0x4d0   : > { %2259 = vmatprep.subr.bf16.mxu1 %v2554_v5 }
 0x4d3   : > { %2260 = vmatpush3.bf16.msra.mxu1 %v2800_v6 }
 0x4d4   : > { %2273 = vmatprep.subr.bf16.mxu1 %v2554_v5 }
 0x58e   : > { %v1039_v52 = vpop.f32.mrf.mxu1 }
 0x58f   : > { %v1040_v53 = vadd.f32 %v2109_v51, %v1039_v52 }
 0x590   : > { %v2247_v55 = vpop.f32.mrf.mxu1 }
 0x591   : > { %v1046_v56 = vadd.f32 %v2837_v14, %v1040_v53 }
 0x592   : > { %v1042_v57 = vpop.f32.mrf.mxu1 }
 0x593   : > { %2398 = vtanh.f32 %v1046_v56  ;;  %v1043_v58 = vadd.f32 %v2110_v54, %v1042_v57 }
 0x594   : > { %v2248_v59 = vpop.f32.mrf.mxu1 }
 0x595   : > { %v1047_v60 = vadd.f32 %v2837_v14, %v1043_v58 }
 0x597   : > { %2400 = vtanh.f32 %v1047_v60 }
 0x5a0   : > { %v2399_v61 = vpop.eup %2398 }
 0x5a1   : > { %1058 = vrot.lane.b32.xlu1 %v2399_v61, %s2557_s15  ;;  %v1050_v63 = vmul.f32 0.5, %v2399_v61 }
 0x5a3   : > { %v1052_v0 = vadd.f32 0.5, %v1050_v63 }
 0x5a4   : > { %v2401_v62 = vpop.eup %2400 }
 0x5a5   : > { %1060 = vrot.lane.b32.xlu0 %v2401_v62, %s2557_s15  ;;  %v1051_v1 = vmul.f32 0.5, %v2401_v62  ;;  %v1054_v10 = vmul.f32 %v1052_v0, %v966_v38  ;;  %v2116_v62 = vld [vmem:[#allocation3 + $0x10] sm:$0xff]  }
 0x5a6   : > { %v2117_v63 = vunpack.c.l.bf16 %v2116_v62 }
 0x5a7   : > { %v1053_v7 = vadd.f32 0.5, %v1051_v1 }
 0x5a9   : > { %v1055_v13 = vmul.f32 %v1053_v7, %v967_v41 }
 0x613   : > { %v1059_v2 = vpop.permute.xlu1 %1058 }
 0x614   : > { %v1064_v3 = vmul.f32 %v1059_v2, %v1052_v0  ;;  %v2118_v2 = vunpack.c.h.bf16 %v2116_v62 }
 0x616   : > { %1068 = vrot.lane.b32.xlu1 %v1064_v3, %s2556_s29 }
 0x617   : > { %v1061_v8 = vpop.permute.xlu0 %1060 }
 0x618   : > { %v1065_v9 = vmul.f32 %v1061_v8, %v1053_v7 }
 0x61a   : > { %1070 = vrot.lane.b32.xlu0 %v1065_v9, %s2556_s29 }
 0x688   : > { %v1069_v11 = vpop.permute.xlu1 %1068 }
 0x689   : > { %v1074_v12 = vadd.f32 %v1069_v11, %v1054_v10 }
 0x68b   : > { %2402 = vtanh.f32 %v1074_v12 }
 0x68c   : > { %v1071_v15 = vpop.permute.xlu0 %1070 }
 0x68d   : > { %v1075_v16 = vadd.f32 %v1071_v15, %v1055_v13 }
 0x68f   : > { %2404 = vtanh.f32 %v1075_v16 }
 0x698   : > { %v2403_v17 = vpop.eup %2402 }
 0x699   : > { %1080 = vrot.lane.b32.xlu1 %v2403_v17, %s2557_s15 }
 0x69c   : > { %v2405_v18 = vpop.eup %2404 }
 0x69d   : > { %1082 = vrot.lane.b32.xlu0 %v2405_v18, %s2557_s15 }
 0x70b   : > { %v1081_v19 = vpop.permute.xlu1 %1080 }
 0x70c   : > { %v2869_v21 = vmul.f32 %v1081_v19, %v1052_v0 }
 0x70f   : > { %v1083_v20 = vpop.permute.xlu0 %1082 }
 0x710   : > { %v2871_v22 = vmul.f32 %v1083_v20, %v1053_v7 }
 0x712   : > { %v1088_v23 = vpack.c.bf16 %v2871_v22, %v2869_v21 }
 0x714   : > { %1108 = vrot.lane.b32.xlu1 %v1088_v23, %s2556_s29 }
 0x786   : > { %v1109_v24 = vpop.permute.xlu1 %1108 }
 0x787   : > { %2254 = vmatmul.mubr.msk.bf16.vlgmr.msra.gmra.mxu0 %vm885_vm3, %v1109_v24 }
 0x788   : > { %2266 = vmatpush3.bf16.msra.mxu0 %v2794_v4  ;;  %2269 = vmatprep.mubr.msk.bf16.mxu0 %vm2555_vm2, %v2554_v5 }
 0x789   : > { %2267 = vmatprep.subr.bf16.mxu0 %v2554_v5 }
 0x78c   : > { %2268 = vmatpush3.bf16.msra.mxu0 %v2800_v6 }
 0x78d   : > { %2281 = vmatprep.subr.bf16.mxu0 %v2554_v5 }
 0x847   : > { %v1147_v27 = vpop.f32.mrf.mxu0 }
 0x848   : > { %v1148_v28 = vadd.f32 %v2113_v26, %v1147_v27 }
 0x849   : > { %v2255_v30 = vpop.f32.mrf.mxu0 }
 0x84a   : > { %v1154_v31 = vadd.f32 %v2837_v14, %v1148_v28 }
 0x84b   : > { %v1150_v32 = vpop.f32.mrf.mxu0 }
 0x84c   : > { %2406 = vtanh.f32 %v1154_v31  ;;  %v1151_v33 = vadd.f32 %v2114_v29, %v1150_v32 }
 0x84d   : > { %v2256_v34 = vpop.f32.mrf.mxu0 }
 0x84e   : > { %v1155_v35 = vadd.f32 %v2837_v14, %v1151_v33 }
 0x850   : > { %2408 = vtanh.f32 %v1155_v35 }
 0x859   : > { %v2407_v36 = vpop.eup %2406 }
 0x85a   : > { %1166 = vrot.lane.b32.xlu0 %v2407_v36, %s2557_s15  ;;  %v1158_v38 = vmul.f32 0.5, %v2407_v36 }
 0x85c   : > { %v1160_v39 = vadd.f32 0.5, %v1158_v38 }
 0x85d   : > { %v2409_v37 = vpop.eup %2408 }
 0x85e   : > { %1168 = vrot.lane.b32.xlu1 %v2409_v37, %s2557_s15  ;;  %v1159_v40 = vmul.f32 0.5, %v2409_v37  ;;  %v1162_v48 = vmul.f32 %v1160_v39, %v1074_v12 }
 0x860   : > { %v1161_v43 = vadd.f32 0.5, %v1159_v40 }
 0x862   : > { %v1163_v51 = vmul.f32 %v1161_v43, %v1075_v16 }
 0x8cc   : > { %v1167_v41 = vpop.permute.xlu0 %1166 }
 0x8cd   : > { %v1172_v42 = vmul.f32 %v1167_v41, %v1160_v39 }
 0x8cf   : > { %1176 = vrot.lane.b32.xlu0 %v1172_v42, %s2556_s29 }
 0x8d0   : > { %v1169_v44 = vpop.permute.xlu1 %1168 }
 0x8d1   : > { %v1173_v45 = vmul.f32 %v1169_v44, %v1161_v43 }
 0x8d3   : > { %1178 = vrot.lane.b32.xlu1 %v1173_v45, %s2556_s29 }
 0x941   : > { %v1177_v49 = vpop.permute.xlu0 %1176 }
 0x942   : > { %v1182_v50 = vadd.f32 %v1177_v49, %v1162_v48 }
 0x944   : > { %2410 = vtanh.f32 %v1182_v50 }
 0x945   : > { %v1179_v52 = vpop.permute.xlu1 %1178 }
 0x946   : > { %v1183_v53 = vadd.f32 %v1179_v52, %v1163_v51 }
 0x948   : > { %2412 = vtanh.f32 %v1183_v53 }
 0x951   : > { %v2411_v54 = vpop.eup %2410 }
 0x952   : > { %1188 = vrot.lane.b32.xlu0 %v2411_v54, %s2557_s15 }
 0x955   : > { %v2413_v55 = vpop.eup %2412 }
 0x956   : > { %1190 = vrot.lane.b32.xlu1 %v2413_v55, %s2557_s15 }
 0x9c4   : > { %v1189_v56 = vpop.permute.xlu0 %1188 }
 0x9c5   : > { %v2891_v58 = vmul.f32 %v1189_v56, %v1160_v39  ;;  %v2120_v39 = vld [vmem:[#allocation3 + $0x8] sm:$0xff]  }
 0x9c6   : > { %v2121_v40 = vunpack.c.l.bf16 %v2120_v39 }
 0x9c8   : > { %v1191_v57 = vpop.permute.xlu1 %1190 }
 0x9c9   : > { %v2893_v59 = vmul.f32 %v1191_v57, %v1161_v43  ;;  %v2122_v43 = vunpack.c.h.bf16 %v2120_v39 }
 0x9cb   : > { %v1196_v60 = vpack.c.bf16 %v2893_v59, %v2891_v58 }
 0x9cd   : > { %1216 = vrot.lane.b32.xlu0 %v1196_v60, %s2556_s29 }
 0xa3f   : > { %v1217_v61 = vpop.permute.xlu0 %1216 }
 0xa40   : > { %2262 = vmatmul.mubr.msk.bf16.vlgmr.msra.gmra.mxu1 %vm885_vm3, %v1217_v61 }
 0xa41   : > { %2274 = vmatpush3.bf16.msra.mxu1 %v2794_v4  ;;  %2277 = vmatprep.mubr.msk.bf16.mxu1 %vm2555_vm2, %v2554_v5 }
 0xa42   : > { %2275 = vmatprep.subr.bf16.mxu1 %v2554_v5 }
 0xa45   : > { %2276 = vmatpush3.bf16.msra.mxu1 %v2800_v6 }
 0xa46   : > { %2289 = vmatprep.subr.bf16.mxu1 %v2554_v5 }
 0xb00   : > { %v1255_v0 = vpop.f32.mrf.mxu1 }
 0xb01   : > { %v1256_v1 = vadd.f32 %v2117_v63, %v1255_v0 }
 0xb02   : > { %v2263_v3 = vpop.f32.mrf.mxu1 }
 0xb03   : > { %v1262_v7 = vadd.f32 %v2837_v14, %v1256_v1 }
 0xb04   : > { %v1258_v8 = vpop.f32.mrf.mxu1 }
 0xb05   : > { %2414 = vtanh.f32 %v1262_v7  ;;  %v1259_v9 = vadd.f32 %v2118_v2, %v1258_v8 }
 0xb06   : > { %v2264_v10 = vpop.f32.mrf.mxu1 }
 0xb07   : > { %v1263_v11 = vadd.f32 %v2837_v14, %v1259_v9 }
 0xb09   : > { %2416 = vtanh.f32 %v1263_v11 }
 0xb12   : > { %v2415_v12 = vpop.eup %2414 }
 0xb13   : > { %1274 = vrot.lane.b32.xlu1 %v2415_v12, %s2557_s15  ;;  %v1266_v15 = vmul.f32 0.5, %v2415_v12 }
 0xb15   : > { %v1268_v16 = vadd.f32 0.5, %v1266_v15 }
 0xb16   : > { %v2417_v13 = vpop.eup %2416 }
 0xb17   : > { %1276 = vrot.lane.b32.xlu0 %v2417_v13, %s2557_s15  ;;  %v1267_v17 = vmul.f32 0.5, %v2417_v13  ;;  %v1270_v25 = vmul.f32 %v1268_v16, %v1182_v50 }
 0xb19   : > { %v1269_v20 = vadd.f32 0.5, %v1267_v17 }
 0xb1b   : > { %v1271_v28 = vmul.f32 %v1269_v20, %v1183_v53 }
 0xb85   : > { %v1275_v18 = vpop.permute.xlu1 %1274 }
 0xb86   : > { %v1280_v19 = vmul.f32 %v1275_v18, %v1268_v16  ;;  %v2124_v18 = vld [vmem:[#allocation3 + $0x20] sm:$0xff]  }
 0xb88   : > { %1284 = vrot.lane.b32.xlu1 %v1280_v19, %s2556_s29  ;;  %v2125_v19 = vunpack.c.l.bf16 %v2124_v18 }
 0xb89   : > { %v1277_v23 = vpop.permute.xlu0 %1276 }
 0xb8a   : > { %v1281_v24 = vmul.f32 %v1277_v23, %v1269_v20 }
 0xb8c   : > { %1286 = vrot.lane.b32.xlu0 %v1281_v24, %s2556_s29  ;;  %v2126_v24 = vunpack.c.h.bf16 %v2124_v18 }
 0xbfa   : > { %v1285_v26 = vpop.permute.xlu1 %1284 }
 0xbfb   : > { %v1290_v27 = vadd.f32 %v1285_v26, %v1270_v25 }
 0xbfd   : > { %2418 = vtanh.f32 %v1290_v27 }
 0xbfe   : > { %v1287_v29 = vpop.permute.xlu0 %1286 }
 0xbff   : > { %v1291_v30 = vadd.f32 %v1287_v29, %v1271_v28 }
 0xc01   : > { %2420 = vtanh.f32 %v1291_v30 }
 0xc0a   : > { %v2419_v31 = vpop.eup %2418 }
 0xc0b   : > { %1296 = vrot.lane.b32.xlu1 %v2419_v31, %s2557_s15 }
 0xc0e   : > { %v2421_v32 = vpop.eup %2420 }
 0xc0f   : > { %1298 = vrot.lane.b32.xlu0 %v2421_v32, %s2557_s15 }
 0xc7d   : > { %v1297_v33 = vpop.permute.xlu1 %1296 }
 0xc7e   : > { %v2913_v35 = vmul.f32 %v1297_v33, %v1268_v16 }
 0xc81   : > { %v1299_v34 = vpop.permute.xlu0 %1298 }
 0xc82   : > { %v2915_v36 = vmul.f32 %v1299_v34, %v1269_v20 }
 0xc84   : > { %v1304_v37 = vpack.c.bf16 %v2915_v36, %v2913_v35 }
 0xc86   : > { %1324 = vrot.lane.b32.xlu1 %v1304_v37, %s2556_s29 }
 0xcf8   : > { %v1325_v38 = vpop.permute.xlu1 %1324 }
 0xcf9   : > { %2270 = vmatmul.mubr.msk.bf16.vlgmr.msra.gmra.mxu0 %vm885_vm3, %v1325_v38 }
 0xcfa   : > { %2282 = vmatpush3.bf16.msra.mxu0 %v2794_v4  ;;  %2285 = vmatprep.mubr.msk.bf16.mxu0 %vm2555_vm2, %v2554_v5 }
 0xcfb   : > { %2283 = vmatprep.subr.bf16.mxu0 %v2554_v5 }
 0xcfe   : > { %2284 = vmatpush3.bf16.msra.mxu0 %v2800_v6 }
 0xdb9   : > { %v1363_v41 = vpop.f32.mrf.mxu0 }
 0xdba   : > { %v1364_v42 = vadd.f32 %v2121_v40, %v1363_v41 }
 0xdbb   : > { %v2271_v44 = vpop.f32.mrf.mxu0 }
 0xdbc   : > { %v1370_v45 = vadd.f32 %v2837_v14, %v1364_v42 }
 0xdbd   : > { %v1366_v48 = vpop.f32.mrf.mxu0 }
 0xdbe   : > { %2422 = vtanh.f32 %v1370_v45  ;;  %v1367_v49 = vadd.f32 %v2122_v43, %v1366_v48 }
 0xdbf   : > { %v2272_v50 = vpop.f32.mrf.mxu0 }
 0xdc0   : > { %v1371_v51 = vadd.f32 %v2837_v14, %v1367_v49 }
 0xdc2   : > { %2424 = vtanh.f32 %v1371_v51 }
 0xdcb   : > { %v2423_v52 = vpop.eup %2422 }
 0xdcc   : > { %1382 = vrot.lane.b32.xlu0 %v2423_v52, %s2557_s15  ;;  %v1374_v54 = vmul.f32 0.5, %v2423_v52 }
 0xdce   : > { %v1376_v55 = vadd.f32 0.5, %v1374_v54 }
 0xdcf   : > { %v2425_v53 = vpop.eup %2424 }
 0xdd0   : > { %1384 = vrot.lane.b32.xlu1 %v2425_v53, %s2557_s15  ;;  %v1375_v56 = vmul.f32 0.5, %v2425_v53  ;;  %v1378_v0 = vmul.f32 %v1376_v55, %v1290_v27 }
 0xdd2   : > { %v1377_v61 = vadd.f32 0.5, %v1375_v56  ;;  %v2128_v56 = vld [vmem:[#allocation3 + $0x28] sm:$0xff]  }
 0xdd4   : > { %v1379_v3 = vmul.f32 %v1377_v61, %v1291_v30 }
 0xe3e   : > { %v1383_v57 = vpop.permute.xlu0 %1382 }
 0xe3f   : > { %v1388_v60 = vmul.f32 %v1383_v57, %v1376_v55  ;;  %v2129_v57 = vunpack.c.l.bf16 %v2128_v56 }
 0xe41   : > { %1392 = vrot.lane.b32.xlu0 %v1388_v60, %s2556_s29 }
 0xe42   : > { %v1385_v62 = vpop.permute.xlu1 %1384 }
 0xe43   : > { %v1389_v63 = vmul.f32 %v1385_v62, %v1377_v61  ;;  %v2130_v62 = vunpack.c.h.bf16 %v2128_v56 }
 0xe45   : > { %1394 = vrot.lane.b32.xlu1 %v1389_v63, %s2556_s29 }
 0xeb3   : > { %v1393_v1 = vpop.permute.xlu0 %1392 }
 0xeb4   : > { %v1398_v2 = vadd.f32 %v1393_v1, %v1378_v0 }
 0xeb6   : > { %2426 = vtanh.f32 %v1398_v2 }
 0xeb7   : > { %v1395_v7 = vpop.permute.xlu1 %1394 }
 0xeb8   : > { %v1399_v8 = vadd.f32 %v1395_v7, %v1379_v3 }
 0xeba   : > { %2428 = vtanh.f32 %v1399_v8 }
 0xec3   : > { %v2427_v9 = vpop.eup %2426 }
 0xec4   : > { %1404 = vrot.lane.b32.xlu0 %v2427_v9, %s2557_s15 }
 0xec7   : > { %v2429_v10 = vpop.eup %2428 }
 0xec8   : > { %1406 = vrot.lane.b32.xlu1 %v2429_v10, %s2557_s15 }
 0xf36   : > { %v1405_v11 = vpop.permute.xlu0 %1404 }
 0xf37   : > { %v2934_v13 = vmul.f32 %v1405_v11, %v1376_v55 }
 0xf3a   : > { %v1407_v12 = vpop.permute.xlu1 %1406 }
 0xf3b   : > { %v2936_v15 = vmul.f32 %v1407_v12, %v1377_v61 }
 0xf3d   : > { %v1412_v16 = vpack.c.bf16 %v2936_v15, %v2934_v13 }
 0xf3f   : > { %1432 = vrot.lane.b32.xlu0 %v1412_v16, %s2556_s29 }
 0xfb1   : > { %v1433_v17 = vpop.permute.xlu0 %1432 }
 0xfb2   : > { %2278 = vmatmul.mubr.msk.bf16.vlgmr.msra.gmra.mxu1 %vm885_vm3, %v1433_v17 }
 0xfb3   : > { %2290 = vmatpush3.bf16.msra.mxu1 %v2794_v4  ;;  %2293 = vmatprep.mubr.msk.bf16.mxu1 %vm2555_vm2, %v2554_v5 }
 0xfb4   : > { %2291 = vmatprep.subr.bf16.mxu1 %v2554_v5 }
 0xfb7   : > { %2292 = vmatpush3.bf16.msra.mxu1 %v2800_v6 }
0x1072   : > { %v1471_v20 = vpop.f32.mrf.mxu1 }
0x1073   : > { %v1472_v23 = vadd.f32 %v2125_v19, %v1471_v20 }
0x1074   : > { %v2279_v25 = vpop.f32.mrf.mxu1 }
0x1075   : > { %v1478_v26 = vadd.f32 %v2837_v14, %v1472_v23 }
0x1076   : > { %v1474_v27 = vpop.f32.mrf.mxu1 }
0x1077   : > { %2430 = vtanh.f32 %v1478_v26  ;;  %v1475_v28 = vadd.f32 %v2126_v24, %v1474_v27 }
0x1078   : > { %v2280_v29 = vpop.f32.mrf.mxu1 }
0x1079   : > { %v1479_v4 = vadd.f32 %v2837_v14, %v1475_v28 }
0x107b   : > { %2432 = vtanh.f32 %v1479_v4 }
0x1084   : > { %v2431_v30 = vpop.eup %2430 }
0x1085   : > { %1490 = vrot.lane.b32.xlu1 %v2431_v30, %s2557_s15  ;;  %v1482_v6 = vmul.f32 0.5, %v2431_v30 }
0x1087   : > { %v1484_v31 = vadd.f32 0.5, %v1482_v6 }
0x1088   : > { %v2433_v5 = vpop.eup %2432 }
0x1089   : > { %1492 = vrot.lane.b32.xlu0 %v2433_v5, %s2557_s15  ;;  %v1483_v32 = vmul.f32 0.5, %v2433_v5  ;;  %v1486_v40 = vmul.f32 %v1484_v31, %v1398_v2 }
0x108b   : > { %v1485_v37 = vadd.f32 0.5, %v1483_v32 }
0x108d   : > { %v1487_v43 = vmul.f32 %v1485_v37, %v1399_v8 }
0x10f7   : > { %v1491_v33 = vpop.permute.xlu1 %1490 }
0x10f8   : > { %v1496_v34 = vmul.f32 %v1491_v33, %v1484_v31 }
0x10fa   : > { %1500 = vrot.lane.b32.xlu1 %v1496_v34, %s2556_s29  ;;  %v2132_v34 = vld [vmem:[#allocation3 + $0x38] sm:$0xff]  }
0x10fb   : > { %v1493_v38 = vpop.permute.xlu0 %1492 }
0x10fc   : > { %v1497_v39 = vmul.f32 %v1493_v38, %v1485_v37 }
0x10fe   : > { %1502 = vrot.lane.b32.xlu0 %v1497_v39, %s2556_s29 }
0x116c   : > { %v1501_v41 = vpop.permute.xlu1 %1500 }
0x116d   : > { %v1506_v42 = vadd.f32 %v1501_v41, %v1486_v40  ;;  %v2134_v40 = vunpack.c.h.bf16 %v2132_v34 }
0x116f   : > { %2434 = vtanh.f32 %v1506_v42 }
0x1170   : > { %v1503_v44 = vpop.permute.xlu0 %1502 }
0x1171   : > { %v1507_v45 = vadd.f32 %v1503_v44, %v1487_v43 }
0x1173   : > { %2436 = vtanh.f32 %v1507_v45 }
0x117c   : > { %v2435_v48 = vpop.eup %2434 }
0x117d   : > { %1512 = vrot.lane.b32.xlu1 %v2435_v48, %s2557_s15 }
0x1180   : > { %v2437_v49 = vpop.eup %2436 }
0x1181   : > { %1514 = vrot.lane.b32.xlu0 %v2437_v49, %s2557_s15 }
0x11ef   : > { %v1513_v50 = vpop.permute.xlu1 %1512 }
0x11f0   : > { %v2955_v52 = vmul.f32 %v1513_v50, %v1484_v31 }
0x11f3   : > { %v1515_v51 = vpop.permute.xlu0 %1514 }
0x11f4   : > { %v2957_v53 = vmul.f32 %v1515_v51, %v1485_v37  ;;  %v2133_v37 = vunpack.c.l.bf16 %v2132_v34 }
0x11f6   : > { %v1520_v54 = vpack.c.bf16 %v2957_v53, %v2955_v52 }
0x11f8   : > { %1540 = vrot.lane.b32.xlu1 %v1520_v54, %s2556_s29 }
0x126a   : > { %v1541_v55 = vpop.permute.xlu1 %1540 }
0x126b   : > { %2286 = vmatmul.mubr.msk.bf16.vlgmr.msra.gmra.mxu0 %vm885_vm3, %v1541_v55 }
0x132b   : > { %v1579_v60 = vpop.f32.mrf.mxu0 }
0x132c   : > { %v1580_v61 = vadd.f32 %v2129_v57, %v1579_v60 }
0x132d   : > { %v2287_v63 = vpop.f32.mrf.mxu0 }
0x132e   : > { %v1586_v0 = vadd.f32 %v2837_v14, %v1580_v61 }
0x132f   : > { %v1582_v1 = vpop.f32.mrf.mxu0 }
0x1330   : > { %2438 = vtanh.f32 %v1586_v0  ;;  %v1583_v2 = vadd.f32 %v2130_v62, %v1582_v1 }
0x1331   : > { %v2288_v3 = vpop.f32.mrf.mxu0 }
0x1332   : > { %v1587_v7 = vadd.f32 %v2837_v14, %v1583_v2 }
0x1334   : > { %2440 = vtanh.f32 %v1587_v7 }
0x133d   : > { %v2439_v8 = vpop.eup %2438 }
0x133e   : > { %1598 = vrot.lane.b32.xlu0 %v2439_v8, %s2557_s15  ;;  %v1590_v10 = vmul.f32 0.5, %v2439_v8  ;;  %v2007_v8 = vpack.c.bf16 %v2847_v46, %v2847_v46  ;;  %v2011_v46 = vpack.c.bf16 %v2891_v58, %v2891_v58  ;;  %v2015_v58 = vpack.c.bf16 %v2934_v13, %v2934_v13 }
0x1340   : > { %v1592_v11 = vadd.f32 0.5, %v1590_v10  ;;  %v2008_v10 = vpack.c.bf16 %v2849_v47, %v2849_v47  ;;  %v2012_v47 = vpack.c.bf16 %v2893_v59, %v2893_v59  ;;  %v2016_v59 = vpack.c.bf16 %v2936_v15, %v2936_v15 }
0x1341   : > { %v2441_v9 = vpop.eup %2440 }
0x1342   : > { %1600 = vrot.lane.b32.xlu1 %v2441_v9, %s2557_s15  ;;  %v1591_v12 = vmul.f32 0.5, %v2441_v9  ;;  %v1594_v23 = vmul.f32 %v1592_v11, %v1506_v42 }
0x1344   : > { %v1593_v18 = vadd.f32 0.5, %v1591_v12  ;;  %v2010_v12 = vpack.c.bf16 %v2871_v22, %v2871_v22  ;;  %v2014_v22 = vpack.c.bf16 %v2915_v36, %v2915_v36  ;;  %v2018_v36 = vpack.c.bf16 %v2957_v53, %v2957_v53 }
0x1346   : > { %v1595_v26 = vmul.f32 %v1593_v18, %v1507_v45 }
0x13b0   : > { %v1599_v16 = vpop.permute.xlu0 %1598 }
0x13b1   : > { %v1604_v17 = vmul.f32 %v1599_v16, %v1592_v11 }
0x13b3   : > { %1608 = vrot.lane.b32.xlu0 %v1604_v17, %s2556_s29 }
0x13b4   : > { %v1601_v19 = vpop.permute.xlu1 %1600 }
0x13b5   : > { %v1605_v20 = vmul.f32 %v1601_v19, %v1593_v18 }
0x13b7   : > { %1610 = vrot.lane.b32.xlu1 %v1605_v20, %s2556_s29 }
0x1425   : > { %v1609_v24 = vpop.permute.xlu0 %1608 }
0x1426   : > { %v1614_v25 = vadd.f32 %v1609_v24, %v1594_v23 }
0x1428   : > { %2442 = vtanh.f32 %v1614_v25 }
0x1429   : > { %v1611_v27 = vpop.permute.xlu1 %1610 }
0x142a   : > { %v1615_v28 = vadd.f32 %v1611_v27, %v1595_v26 }
0x142c   : > { %2444 = vtanh.f32 %v1615_v28 }
0x1435   : > { %v2443_v29 = vpop.eup %2442 }
0x1436   : > { %1620 = vrot.lane.b32.xlu0 %v2443_v29, %s2557_s15 }
0x1439   : > { %v2445_v4 = vpop.eup %2444 }
0x143a   : > { %1622 = vrot.lane.b32.xlu1 %v2445_v4, %s2557_s15 }
0x14a8   : > { %v1621_v30 = vpop.permute.xlu0 %1620 }
0x14a9   : > { %v2971_v6 = vmul.f32 %v1621_v30, %v1592_v11  ;;  %v2009_v11 = vpack.c.bf16 %v2869_v21, %v2869_v21  ;;  %v2013_v21 = vpack.c.bf16 %v2913_v35, %v2913_v35  ;;  %v2017_v35 = vpack.c.bf16 %v2955_v52, %v2955_v52 }
0x14ab   : > { %v2019_v13 = vpack.c.bf16 %v2971_v6, %v2971_v6 }
0x14ac   : > { %v1623_v5 = vpop.permute.xlu1 %1622 }
0x14ad   : > { %v2973_v31 = vmul.f32 %v1623_v5, %v1593_v18 }
0x14af   : > { %v1628_v32 = vpack.c.bf16 %v2973_v31, %v2971_v6  ;;  %v2020_v15 = vpack.c.bf16 %v2973_v31, %v2973_v31 }
0x14b1   : > { %1648 = vrot.lane.b32.xlu0 %v1628_v32, %s2556_s29 }
0x1523   : > { %v1649_v33 = vpop.permute.xlu0 %1648 }
0x1524   : > { %2294 = vmatmul.mubr.msk.bf16.vlgmr.msra.gmra.mxu1 %vm885_vm3, %v1649_v33 }
0x15e4   : > { %v1687_v38 = vpop.f32.mrf.mxu1 }
0x15e5   : > { %v1688_v39 = vadd.f32 %v2133_v37, %v1687_v38 }
0x15e6   : > { %v2295_v41 = vpop.f32.mrf.mxu1 }
0x15e7   : > { %v1694_v42 = vadd.f32 %v2837_v14, %v1688_v39 }
0x15e8   : > { %v1690_v43 = vpop.f32.mrf.mxu1 }
0x15e9   : > { %2446 = vtanh.f32 %v1694_v42  ;;  %v1691_v44 = vadd.f32 %v2134_v40, %v1690_v43 }
0x15ea   : > { %v2296_v45 = vpop.f32.mrf.mxu1 }
0x15eb   : > { %v1695_v48 = vadd.f32 %v2837_v14, %v1691_v44 }
0x15ed   : > { %2448 = vtanh.f32 %v1695_v48 }
0x15f6   : > { %v2447_v49 = vpop.eup %2446 }
0x15f7   : > { %1706 = vrot.lane.b32.xlu1 %v2447_v49, %s2557_s15  ;;  %v1698_v51 = vmul.f32 0.5, %v2447_v49 }
0x15f9   : > { %v1700_v54 = vadd.f32 0.5, %v1698_v51 }
0x15fa   : > { %v2449_v50 = vpop.eup %2448 }
0x15fb   : > { %1708 = vrot.lane.b32.xlu0 %v2449_v50, %s2557_s15  ;;  %v1699_v55 = vmul.f32 0.5, %v2449_v50  ;;  %v1702_v14 = vmul.f32 %v1700_v54, %v1614_v25 }
0x15fd   : > { %v1701_v60 = vadd.f32 0.5, %v1699_v55 }
0x15ff   : > { %v1703_v1 = vmul.f32 %v1701_v60, %v1615_v28 }
0x1669   : > { %v1707_v56 = vpop.permute.xlu1 %1706 }
0x166a   : > { %v1712_v57 = vmul.f32 %v1707_v56, %v1700_v54 }
0x166c   : > { %1716 = vrot.lane.b32.xlu1 %v1712_v57, %s2556_s29 }
0x166d   : > { %v1709_v61 = vpop.permute.xlu0 %1708 }
0x166e   : > { %v1713_v62 = vmul.f32 %v1709_v61, %v1701_v60 }
0x1670   : > { %1718 = vrot.lane.b32.xlu0 %v1713_v62, %s2556_s29 }
0x16de   : > { %v1717_v63 = vpop.permute.xlu1 %1716 }
0x16df   : > { %v1722_v0 = vadd.f32 %v1717_v63, %v1702_v14 }
0x16e1   : > { %2450 = vtanh.f32 %v1722_v0 }
0x16e2   : > { %v1719_v2 = vpop.permute.xlu0 %1718 }
0x16e3   : > { %v1723_v3 = vadd.f32 %v1719_v2, %v1703_v1 }
0x16e5   : > { %2452 = vtanh.f32 %v1723_v3 }
0x16ee   : > { %v2451_v7 = vpop.eup %2450 }
0x16ef   : > { %1728 = vrot.lane.b32.xlu1 %v2451_v7, %s2557_s15 }
0x16f2   : > { %v2453_v9 = vpop.eup %2452 }
0x16f3   : > { %986 = vrot.lane.b32.xlu1 %v2007_v8, %s2556_s29  ;;  %1730 = vrot.lane.b32.xlu0 %v2453_v9, %s2557_s15 }
0x16f7   : > { %1094 = vrot.lane.b32.xlu1 %v2009_v11, %s2556_s29  ;;  %988 = vrot.lane.b32.xlu0 %v2008_v10, %s2556_s29 }
0x16fb   : > { %1202 = vrot.lane.b32.xlu1 %v2011_v46, %s2556_s29  ;;  %1096 = vrot.lane.b32.xlu0 %v2010_v12, %s2556_s29 }
0x16ff   : > { %1310 = vrot.lane.b32.xlu1 %v2013_v21, %s2556_s29  ;;  %1204 = vrot.lane.b32.xlu0 %v2012_v47, %s2556_s29 }
0x1703   : > { %1418 = vrot.lane.b32.xlu1 %v2015_v58, %s2556_s29  ;;  %1312 = vrot.lane.b32.xlu0 %v2014_v22, %s2556_s29 }
0x1707   : > { %1526 = vrot.lane.b32.xlu1 %v2017_v35, %s2556_s29  ;;  %1420 = vrot.lane.b32.xlu0 %v2016_v59, %s2556_s29 }
0x170b   : > { %1634 = vrot.lane.b32.xlu1 %v2019_v13, %s2556_s29  ;;  %1528 = vrot.lane.b32.xlu0 %v2018_v36, %s2556_s29 }
0x170f   : > { %1636 = vrot.lane.b32.xlu0 %v2020_v15, %s2556_s29 }
0x1761   : > { %v1729_v52 = vpop.permute.xlu1 %1728 }
0x1762   : > { %v1734_v16 = vmul.f32 %v1729_v52, %v1700_v54 }
0x1764   : > { %1753 = vrot.lane.b32.xlu1 %v1734_v16, %s2556_s29  ;;  %v2021_v53 = vpack.c.bf16 %v1734_v16, %v1734_v16 }
0x1765   : > { %v987_v17 = vpop.permute.xlu1 %986  ;;  %v1731_v18 = vpop.permute.xlu0 %1730 }
0x1766   : > { %993 = vst.msk [vmem:[#allocation2] sm:$0xf] %vm992_vm4, %v987_v17  ;;  %v1735_v19 = vmul.f32 %v1731_v18, %v1701_v60 }
0x1768   : > { %1742 = vrot.lane.b32.xlu1 %v2021_v53, %s2556_s29  ;;  %1755 = vrot.lane.b32.xlu0 %v1735_v19, %s2556_s29  ;;  %v2022_v24 = vpack.c.bf16 %v1735_v19, %v1735_v19 }
0x1769   : > { %v1095_v20 = vpop.permute.xlu1 %1094  ;;  %v989_v23 = vpop.permute.xlu0 %988 }
0x176a   : > { %1101 = vst.msk [vmem:[#allocation2 + $0x8] sm:$0xf] %vm992_vm4, %v1095_v20  ;;  %994 = vst.msk [vmem:[#allocation2 + $0x4] sm:$0xf] %vm992_vm4, %v989_v23 }
0x176c   : > { %1765 = vrot.lane.b32.xlu1 %v1722_v0, %s2558_s9  ;;  %1744 = vrot.lane.b32.xlu0 %v2022_v24, %s2556_s29 }
0x176d   : > { %v1203_v25 = vpop.permute.xlu1 %1202  ;;  %v1097_v26 = vpop.permute.xlu0 %1096 }
0x176e   : > { %1209 = vst.msk [vmem:[#allocation2 + $0x10] sm:$0xf] %vm992_vm4, %v1203_v25  ;;  %1102 = vst.msk [vmem:[#allocation2 + $0xc] sm:$0xf] %vm992_vm4, %v1097_v26 }
0x1770   : > { %1767 = vrot.lane.b32.xlu0 %v1723_v3, %s2558_s9 }
0x1771   : > { %v1311_v27 = vpop.permute.xlu1 %1310  ;;  %v1205_v28 = vpop.permute.xlu0 %1204 }
0x1772   : > { %1317 = vst.msk [vmem:[#allocation2 + $0x18] sm:$0xf] %vm992_vm4, %v1311_v27  ;;  %1210 = vst.msk [vmem:[#allocation2 + $0x14] sm:$0xf] %vm992_vm4, %v1205_v28 }
0x1775   : > { %v1419_v29 = vpop.permute.xlu1 %1418  ;;  %v1313_v4 = vpop.permute.xlu0 %1312 }
0x1776   : > { %1425 = vst.msk [vmem:[#allocation2 + $0x20] sm:$0xf] %vm992_vm4, %v1419_v29  ;;  %1318 = vst.msk [vmem:[#allocation2 + $0x1c] sm:$0xf] %vm992_vm4, %v1313_v4 }
0x1779   : > { %v1527_v30 = vpop.permute.xlu1 %1526  ;;  %v1421_v5 = vpop.permute.xlu0 %1420 }
0x177a   : > { %1533 = vst.msk [vmem:[#allocation2 + $0x28] sm:$0xf] %vm992_vm4, %v1527_v30  ;;  %1426 = vst.msk [vmem:[#allocation2 + $0x24] sm:$0xf] %vm992_vm4, %v1421_v5 }
0x177d   : > { %v1635_v6 = vpop.permute.xlu1 %1634  ;;  %v1529_v31 = vpop.permute.xlu0 %1528 }
0x177e   : > { %1641 = vst.msk [vmem:[#allocation2 + $0x30] sm:$0xf] %vm992_vm4, %v1635_v6  ;;  %1534 = vst.msk [vmem:[#allocation2 + $0x2c] sm:$0xf] %vm992_vm4, %v1529_v31 }
0x1781   : > { %v1637_v32 = vpop.permute.xlu0 %1636 }
0x1782   : > { %1642 = vst.msk [vmem:[#allocation2 + $0x34] sm:$0xf] %vm992_vm4, %v1637_v32 }
0x17d6   : > { %v1754_v33 = vpop.permute.xlu1 %1753 }
0x17d7   : > { %1761 = vst.msk [vmem:[%s1760_s11] sm:$0xff] %vm885_vm3, %v1754_v33 }
0x17da   : > { %v1743_v34 = vpop.permute.xlu1 %1742  ;;  %v1756_v37 = vpop.permute.xlu0 %1755 }
0x17db   : > { %1749 = vst.msk [vmem:[#allocation2 + $0x38] sm:$0xf] %vm992_vm4, %v1743_v34 }
0x17dc   : > { %1762 = vst.msk [vmem:[%s1760_s11 + $0x8] sm:$0xff] %vm885_vm3, %v1756_v37 }
0x17de   : > { %v1766_v38 = vpop.permute.xlu1 %1765  ;;  %v1745_v39 = vpop.permute.xlu0 %1744 }
0x17df   : > { %1772 = vst.msk [vmem:[%s1771_s21] sm:$0xff] %vm885_vm3, %v1766_v38 }
0x17e0   : > { %1750 = vst.msk [vmem:[#allocation2 + $0x3c] sm:$0xf] %vm992_vm4, %v1745_v39 }
0x17e2   : > { %v1768_v40 = vpop.permute.xlu0 %1767 }
0x17e3   : > { %1773 = vst.msk [vmem:[%s1771_s21 + $0x8] sm:$0xff] %vm885_vm3, %v1768_v40 }
0x17e4 PF: > { %p19_p10 = scmp.ge.s32.totalorder %s2611_s23, 12   ;;  %s3085_s18 = smov %s2540_s19 }
0x17e5   : > { %s3086_s19 = smov %s2544_s20  ;;  %s3087_s20 = smov %s2621_s26 }
0x17e6   : > { %s3088_s21 = smov %s2611_s23  ;;  %21 = sbr.rel (!%p19_p10) target bundleno = 5 (0x5), region = 122 }
0x17eb   :  { %1791 = vsyncpa [#allocation5], 1 }
0x17ec   :  { %1793 = vsyncpa [#allocation5 + $0x1], 1 }
0x17ed   :  { %1794 = vsyncpa [#allocation7], 1 }
0x17ee   :  { %1796 = vsyncpa [#allocation7 + $0x1], 1 }

</bundles_post_ra>
